<compile_context>
chip_gen: v6e
topology: v6e:2x2x1
jax: 0.10.0
libtpu: 0.0.40
codegen_flags: <defaults>
</compile_context>

<pallas_src>
import functools

import jax
import jax.numpy as jnp
from jax import lax
from jax.experimental import pallas as pl
from jax.experimental.pallas import tpu as pltpu

EPS = 1e-8        # matches nn.LayerNorm(eps=1e-08)
NEG_INF = -1e30   # additive causal mask value
LANE = 128
SUBLANE = 8


def _round_up(x, m):
    return ((x + m - 1) // m) * m


# --------------------------------------------------------------------------- kernels

def make_block_kernel(num_heads, dhp, h_true):
    """One transformer block per (batch_tile, block) grid step; activation carried in VMEM."""
    nh = num_heads

    def kernel(x_ref, tmask_ref, causal_ref,
               ln1g_ref, ln1b_ref,
               wq_ref, bq_ref, wkv_ref, bkv_ref,
               wo_ref, bo_ref,
               ln2g_ref, ln2b_ref,
               w1_ref, b1_ref, w2_ref, b2_ref,
               out_ref, acc_ref):
        blk = pl.program_id(1)

        @pl.when(blk == 0)
        def _init():
            acc_ref[...] = x_ref[...]

        bt, Tp, Hp = acc_ref.shape
        M = bt * Tp
        Hqkv = nh * dhp
        inv_h = 1.0 / float(h_true)

        # LayerNorm statistics only over the true (unpadded) hidden lanes.
        hmask = (lax.broadcasted_iota(jnp.int32, (1, Hp), 1) < h_true
                 ).astype(jnp.float32)

        def layernorm(x2, g, b):
            mu = jnp.sum(x2, axis=-1, keepdims=True) * inv_h
            xc = (x2 - mu) * hmask
            var = jnp.sum(xc * xc, axis=-1, keepdims=True) * inv_h
            return xc * lax.rsqrt(var + EPS) * g + b

        x2 = acc_ref[...].reshape(M, Hp)            # (M, Hp) f32; padded lanes are zero

        # --- attention: LN only on queries (SASRec quirk); K/V use raw activations ---
        q_in = layernorm(x2, ln1g_ref[0], ln1b_ref[0])
        qp = jnp.dot(q_in.astype(jnp.bfloat16), wq_ref[0],
                     preferred_element_type=jnp.float32) + bq_ref[0]
        kvp = jnp.dot(x2.astype(jnp.bfloat16), wkv_ref[0],
                      preferred_element_type=jnp.float32) + bkv_ref[0]

        causal = causal_ref[...]
        wo = wo_ref[0]
        mha = jnp.zeros((M, Hp), jnp.float32)
        for h in range(nh):                         # heads are 128-lane-aligned slices
            lo, hi = h * dhp, (h + 1) * dhp
            q_h = qp[:, lo:hi].reshape(bt, Tp, dhp).astype(jnp.bfloat16)
            k_h = kvp[:, lo:hi].reshape(bt, Tp, dhp).astype(jnp.bfloat16)
            v_h = kvp[:, Hqkv + lo:Hqkv + hi].reshape(bt, Tp, dhp).astype(jnp.bfloat16)
            s = jnp.einsum('bqd,bkd->bqk', q_h, k_h,
                           preferred_element_type=jnp.float32)
            s = s + causal[None, :, :]
            m = jnp.max(s, axis=-1, keepdims=True)
            e = jnp.exp(s - m)
            denom = jnp.sum(e, axis=-1, keepdims=True)
            p = (e * pl.reciprocal(denom, approx=True)).astype(jnp.bfloat16)
            ctx_h = jnp.einsum('bqk,bkd->bqd', p, v_h,
                               preferred_element_type=jnp.float32)
            mha = mha + jnp.dot(ctx_h.reshape(M, dhp).astype(jnp.bfloat16),
                                wo[lo:hi, :],
                                preferred_element_type=jnp.float32)
        mha = mha + bo_ref[0]

        seqs = q_in + mha                           # residual adds the LayerNorm'd queries

        # --- PointWiseFeedForward: Conv1d(k=1) -> ReLU -> Conv1d(k=1), residual on h2 ---
        h2 = layernorm(seqs, ln2g_ref[0], ln2b_ref[0])
        f1 = jnp.maximum(
            jnp.dot(h2.astype(jnp.bfloat16), w1_ref[0],
                    preferred_element_type=jnp.float32) + b1_ref[0], 0.0)
        f2 = jnp.dot(f1.astype(jnp.bfloat16), w2_ref[0],
                     preferred_element_type=jnp.float32) + b2_ref[0]

        res = ((h2 + f2).reshape(bt, Tp, Hp)
               * tmask_ref[...][:, :, None])        # zero padded timeline rows
        acc_ref[...] = res
        out_ref[...] = res

    return kernel


def make_final_kernel(h_true):
    """Last LayerNorm + (log_feats * pos/neg_embs).sum(-1)."""

    def kernel(x_ref, g_ref, b_ref, pos_ref, neg_ref, pos_out_ref, neg_out_ref):
        bt, Tp, Hp = x_ref.shape
        M = bt * Tp
        inv_h = 1.0 / float(h_true)
        hmask = (lax.broadcasted_iota(jnp.int32, (1, Hp), 1) < h_true
                 ).astype(jnp.float32)
        x2 = x_ref[...].reshape(M, Hp)
        mu = jnp.sum(x2, axis=-1, keepdims=True) * inv_h
        xc = (x2 - mu) * hmask
        var = jnp.sum(xc * xc, axis=-1, keepdims=True) * inv_h
        feats = (xc * lax.rsqrt(var + EPS) * g_ref[...] + b_ref[...]
                 ).reshape(bt, Tp, Hp)
        pos_out_ref[...] = jnp.sum(feats * pos_ref[...], axis=-1)
        neg_out_ref[...] = jnp.sum(feats * neg_ref[...], axis=-1)

    return kernel


# ---------------------------------------------------------------- trace-time weight prep

def _prep_head_out(w, b, nh, dh, dhp, Hp):
    # PyTorch Linear weight (out=nh*dh, in=H)  ->  (Hp, nh*dhp) for x @ W layout,
    # each head zero-padded to a full 128-lane slot.
    H = w.shape[1]
    w_t = w.T.reshape(H, nh, dh)
    w_t = jnp.pad(w_t, ((0, Hp - H), (0, 0), (0, dhp - dh))).reshape(Hp, nh * dhp)
    b_p = jnp.pad(b.reshape(nh, dh), ((0, 0), (0, dhp - dh))).reshape(1, nh * dhp)
    return w_t, b_p


def _prep_head_in(w, b, nh, dh, dhp, Hp):
    # Output projection (out=H, in=nh*dh) -> (nh*dhp, Hp) matching the padded head layout.
    H = w.shape[0]
    w_t = w.T.reshape(nh, dh, H)
    w_t = jnp.pad(w_t, ((0, 0), (0, dhp - dh), (0, Hp - H))).reshape(nh * dhp, Hp)
    b_p = jnp.pad(b, (0, Hp - H)).reshape(1, Hp)
    return w_t, b_p


def _prep_dense(w, b, Hp):
    H_out, H_in = w.shape
    w_t = jnp.pad(w.T, ((0, Hp - H_in), (0, Hp - H_out)))
    b_p = jnp.pad(b, (0, Hp - H_out)).reshape(1, Hp)
    return w_t, b_p


def _pad_vec(v, Hp):
    v = v.reshape(1, -1)
    return jnp.pad(v, ((0, 0), (0, Hp - v.shape[1])))


def _prep_block(blk, nh, dh, dhp, Hp, scale):
    w_q, w_k, w_v = jnp.split(blk['w_in'], 3, axis=0)
    b_q, b_k, b_v = jnp.split(blk['b_in'], 3, axis=0)
    wq_p, bq_p = _prep_head_out(w_q * scale, b_q * scale, nh, dh, dhp, Hp)
    wk_p, bk_p = _prep_head_out(w_k, b_k, nh, dh, dhp, Hp)
    wv_p, bv_p = _prep_head_out(w_v, b_v, nh, dh, dhp, Hp)
    wo_p, bo_p = _prep_head_in(blk['w_out'], blk['b_out'], nh, dh, dhp, Hp)
    w1_p, b1_p = _prep_dense(blk['w1'], blk['b1'], Hp)
    w2_p, b2_p = _prep_dense(blk['w2'], blk['b2'], Hp)
    return dict(
        ln1g=_pad_vec(blk['ln1_g'], Hp), ln1b=_pad_vec(blk['ln1_b'], Hp),
        wq=wq_p, bq=bq_p,
        wkv=jnp.concatenate([wk_p, wv_p], axis=1),
        bkv=jnp.concatenate([bk_p, bv_p], axis=1),
        wo=wo_p, bo=bo_p,
        ln2g=_pad_vec(blk['ln2_g'], Hp), ln2b=_pad_vec(blk['ln2_b'], Hp),
        w1=w1_p, b1=b1_p, w2=w2_p, b2=b2_p)


def _choose_batch_tile(B, Tp, Hp, target_bytes=512 * 1024):
    # Tile must divide B and be either all of B or a multiple of 8 (sublane constraint).
    # Keep per-tile activation <= target so the ~dozen live (bt*Tp, Hp) f32 intermediates
    # stay well inside scoped VMEM on every generation (v7x: 64 MiB physical).
    cands = sorted({d for d in range(8, B, 8) if B % d == 0} | {B})
    fits = [c for c in cands if c * Tp * Hp * 4 <= target_bytes]
    return max(fits) if fits else min(cands)


# --------------------------------------------------------------------------- parameters

def init_sasrec_params(key, item_num, hidden, max_len, num_blocks):
    keys = jax.random.split(key, 2 + num_blocks * 8)
    ki = iter(keys)
    item_emb = jax.random.normal(next(ki), (item_num + 1, hidden), jnp.float32) * 0.1
    item_emb = item_emb.at[item_num].set(0.0)  # padding_idx row zeroed
    pos_emb = jax.random.normal(next(ki), (max_len, hidden), jnp.float32) * 0.1

    blocks = []
    for _ in range(num_blocks):
        blocks.append({
            'ln1_g': jnp.ones((1, hidden), jnp.float32),
            'ln1_b': jnp.zeros((1, hidden), jnp.float32),
            'w_in': jax.random.normal(next(ki), (3 * hidden, hidden), jnp.float32) * 0.05,
            'b_in': jax.random.normal(next(ki), (3 * hidden,), jnp.float32) * 0.01,
            'w_out': jax.random.normal(next(ki), (hidden, hidden), jnp.float32) * 0.05,
            'b_out': jax.random.normal(next(ki), (hidden,), jnp.float32) * 0.01,
            'ln2_g': jnp.ones((1, hidden), jnp.float32),
            'ln2_b': jnp.zeros((1, hidden), jnp.float32),
            'w1': jax.random.normal(next(ki), (hidden, hidden), jnp.float32) * 0.05,
            'b1': jax.random.normal(next(ki), (hidden,), jnp.float32) * 0.01,
            'w2': jax.random.normal(next(ki), (hidden, hidden), jnp.float32) * 0.05,
            'b2': jax.random.normal(next(ki), (hidden,), jnp.float32) * 0.01,
        })

    return {
        'item_emb': item_emb,
        'pos_emb': pos_emb,
        'blocks': blocks,
        'last_ln_g': jnp.ones((1, hidden), jnp.float32),
        'last_ln_b': jnp.zeros((1, hidden), jnp.float32),
    }


# --------------------------------------------------------------------------- forward

def sasrec_forward(params, log_seqs, pos_seqs, neg_seqs, num_heads):
    item_emb = params['item_emb']
    H = item_emb.shape[1]
    B, T = log_seqs.shape
    pad_token = item_emb.shape[0] - 1
    nh = num_heads
    dh = H // nh
    Hp = _round_up(H, LANE)        # hidden padded to the 128-lane vreg width
    dhp = _round_up(dh, LANE)      # each head padded to a full lane slot (aligned slices)
    Hqkv = nh * dhp
    Tp = _round_up(T, SUBLANE)
    L = len(params['blocks'])
    scale = dh ** -0.5             # PyTorch MHA 1/sqrt(head_dim), folded into W_q/b_q

    # ---- prepack & pad weights (trace-time, outside the kernels) ----
    prepped = [_prep_block(blk, nh, dh, dhp, Hp, scale) for blk in params['blocks']]

    def stack(name, dtype=jnp.float32):
        return jnp.stack([p[name] for p in prepped]).astype(dtype)

    ln1g_s, ln1b_s = stack('ln1g'), stack('ln1b')
    wq_s, bq_s = stack('wq', jnp.bfloat16), stack('bq')
    wkv_s, bkv_s = stack('wkv', jnp.bfloat16), stack('bkv')
    wo_s, bo_s = stack('wo', jnp.bfloat16), stack('bo')
    ln2g_s, ln2b_s = stack('ln2g'), stack('ln2b')
    w1_s, b1_s = stack('w1', jnp.bfloat16), stack('b1')
    w2_s, b2_s = stack('w2', jnp.bfloat16), stack('b2')
    last_g = _pad_vec(params['last_ln_g'], Hp)
    last_b = _pad_vec(params['last_ln_b'], Hp)

    item_emb_p = jnp.pad(item_emb, ((0, 0), (0, Hp - H)))
    pos_emb_p = jnp.pad(params['pos_emb'][:T], ((0, Tp - T), (0, Hp - H)))

    pad_t = ((0, 0), (0, Tp - T))
    log_p = jnp.pad(log_seqs, pad_t, constant_values=pad_token)
    pos_p = jnp.pad(pos_seqs, pad_t, constant_values=pad_token)
    neg_p = jnp.pad(neg_seqs, pad_t, constant_values=pad_token)

    # log2feats prologue: embedding gathers + scale + position emb + timeline mask (JAX glue)
    seqs = jnp.take(item_emb_p, log_p, axis=0) * (H ** 0.5)
    seqs = seqs + pos_emb_p[None, :, :]
    tmask = (log_p != pad_token).astype(jnp.float32)          # (B, Tp): 1 valid, 0 pad
    seqs = seqs * tmask[..., None]
    # TODO(synk): emb_dropout / attention dropout / FFN dropouts are identity (eval mode).

    # causal mask computed once, passed in as a resident VMEM constant
    row = lax.broadcasted_iota(jnp.int32, (Tp, Tp), 0)
    col = lax.broadcasted_iota(jnp.int32, (Tp, Tp), 1)
    causal = jnp.where(col > row, NEG_INF, 0.0).astype(jnp.float32)

    bt = _choose_batch_tile(B, Tp, Hp)
    nb = B // bt

    act_spec = pl.BlockSpec((bt, Tp, Hp), lambda i, l: (i, 0, 0))

    def wspec(*shape):
        return pl.BlockSpec((1,) + shape, lambda i, l: (l, 0, 0))

    in_specs = [
        act_spec,                                          # initial activations
        pl.BlockSpec((bt, Tp), lambda i, l: (i, 0)),       # timeline mask
        pl.BlockSpec((Tp, Tp), lambda i, l: (0, 0)),       # causal mask (resident)
        wspec(1, Hp), wspec(1, Hp),                        # ln1 gamma / beta
        wspec(Hp, Hqkv), wspec(1, Hqkv),                   # W_q (scale folded), b_q
        wspec(Hp, 2 * Hqkv), wspec(1, 2 * Hqkv),           # fused W_kv, b_kv
        wspec(Hqkv, Hp), wspec(1, Hp),                     # W_out, b_out
        wspec(1, Hp), wspec(1, Hp),                        # ln2 gamma / beta
        wspec(Hp, Hp), wspec(1, Hp),                       # FFN conv1
        wspec(Hp, Hp), wspec(1, Hp),                       # FFN conv2
    ]

    feats = pl.pallas_call(
        make_block_kernel(nh, dhp, H),
        grid=(nb, L),
        in_specs=in_specs,
        out_specs=act_spec,
        out_shape=jax.ShapeDtypeStruct((B, Tp, Hp), jnp.float32),
        scratch_shapes=[pltpu.VMEM((bt, Tp, Hp), jnp.float32)],
        compiler_params=pltpu.CompilerParams(
            dimension_semantics=("parallel", "arbitrary"),
            vmem_limit_bytes=32 * 1024 * 1024),
    )(seqs, tmask, causal,
      ln1g_s, ln1b_s, wq_s, bq_s, wkv_s, bkv_s, wo_s, bo_s,
      ln2g_s, ln2b_s, w1_s, b1_s, w2_s, b2_s)

    pos_embs = jnp.take(item_emb_p, pos_p, axis=0)
    neg_embs = jnp.take(item_emb_p, neg_p, axis=0)

    tile3 = pl.BlockSpec((bt, Tp, Hp), lambda i: (i, 0, 0))
    vec = pl.BlockSpec((1, Hp), lambda i: (0, 0))
    logit_spec = pl.BlockSpec((bt, Tp), lambda i: (i, 0))
    pos_logits, neg_logits = pl.pallas_call(
        make_final_kernel(H),
        grid=(nb,),
        in_specs=[tile3, vec, vec, tile3, tile3],
        out_specs=(logit_spec, logit_spec),
        out_shape=(jax.ShapeDtypeStruct((B, Tp), jnp.float32),
                   jax.ShapeDtypeStruct((B, Tp), jnp.float32)),
        compiler_params=pltpu.CompilerParams(
            dimension_semantics=("parallel",),
            vmem_limit_bytes=32 * 1024 * 1024),
    )(feats, last_g, last_b, pos_embs, neg_embs)

    return pos_logits[:, :T], neg_logits[:, :T]


# ------------------------------------------------------------------ pure-JAX reference

def sasrec_forward_ref(params, log_seqs, pos_seqs, neg_seqs, num_heads):
    item_emb = params['item_emb']
    H = item_emb.shape[1]
    B, T = log_seqs.shape
    pad_token = item_emb.shape[0] - 1
    nh = num_heads
    dh = H // nh

    def ln(x, g, b):
        mu = jnp.mean(x, axis=-1, keepdims=True)
        var = jnp.mean((x - mu) ** 2, axis=-1, keepdims=True)
        return (x - mu) / jnp.sqrt(var + EPS) * g + b

    seqs = item_emb[log_seqs] * (H ** 0.5) + params['pos_emb'][None, :T]
    tmask = (log_seqs != pad_token).astype(jnp.float32)[..., None]
    seqs = seqs * tmask
    causal = jnp.where(jnp.triu(jnp.ones((T, T), bool), k=1), -jnp.inf, 0.0)

    for blk in params['blocks']:
        w_q, w_k, w_v = jnp.split(blk['w_in'], 3, axis=0)
        b_q, b_k, b_v = jnp.split(blk['b_in'], 3, axis=0)
        q_in = ln(seqs, blk['ln1_g'], blk['ln1_b'])
        q = (q_in @ w_q.T + b_q).reshape(B, T, nh, dh)
        k = (seqs @ w_k.T + b_k).reshape(B, T, nh, dh)
        v = (seqs @ w_v.T + b_v).reshape(B, T, nh, dh)
        s = jnp.einsum('bqhd,bkhd->bhqk', q, k) / jnp.sqrt(dh)
        s = s + causal[None, None]
        p = jax.nn.softmax(s, axis=-1)
        ctx = jnp.einsum('bhqk,bkhd->bqhd', p, v).reshape(B, T, H)
        mha = ctx @ blk['w_out'].T + blk['b_out']
        seqs = q_in + mha
        h2 = ln(seqs, blk['ln2_g'], blk['ln2_b'])
        f1 = jnp.maximum(h2 @ blk['w1'].T + blk['b1'], 0.0)
        f2 = f1 @ blk['w2'].T + blk['b2']
        seqs = (h2 + f2) * tmask

    feats = ln(seqs, params['last_ln_g'], params['last_ln_b'])
    pos_logits = jnp.sum(feats * item_emb[pos_seqs], axis=-1)
    neg_logits = jnp.sum(feats * item_emb[neg_seqs], axis=-1)
    return pos_logits, neg_logits


if __name__ == "__main__":
    item_num, hidden_units, max_len = 50, 32, 8
    num_blocks, num_heads = 2, 2
    B, T = 2, 8

    key = jax.random.PRNGKey(0)
    kp, k1, k2, k3 = jax.random.split(key, 4)
    params = init_sasrec_params(kp, item_num, hidden_units, max_len, num_blocks)

    log_seqs = jax.random.randint(k1, (B, T), 0, item_num)
    log_seqs = log_seqs.at[0, 0].set(item_num)  # exercise the padding mask
    pos_seqs = jax.random.randint(k2, (B, T), 0, item_num)
    neg_seqs = jax.random.randint(k3, (B, T), 0, item_num)

    fwd = jax.jit(functools.partial(sasrec_forward, num_heads=num_heads))
    pos_logits, neg_logits = fwd(params, log_seqs, pos_seqs, neg_seqs)
    jax.block_until_ready((pos_logits, neg_logits))
    assert pos_logits.shape == (B, T) and neg_logits.shape == (B, T)

    # correctness vs a pure-JAX f32 reference (kernel uses bf16 MXU operands)
    ref_pos, ref_neg = jax.jit(
        functools.partial(sasrec_forward_ref, num_heads=num_heads)
    )(params, log_seqs, pos_seqs, neg_seqs)
    assert jnp.allclose(pos_logits, ref_pos, atol=0.15, rtol=0.1), \
        float(jnp.max(jnp.abs(pos_logits - ref_pos)))
    assert jnp.allclose(neg_logits, ref_neg, atol=0.15, rtol=0.1), \
        float(jnp.max(jnp.abs(neg_logits - ref_neg)))

    print("KERNEL_OK")
</pallas_src>

<mosaic_0001>
module attributes {stable_mosaic.version = 11 : i64} {
  func.func @kernel(%arg0: i32, %arg1: memref<2x8x128xf32, #tpu.memory_space<vmem>>, %arg2: memref<1x128xf32, #tpu.memory_space<vmem>>, %arg3: memref<1x128xf32, #tpu.memory_space<vmem>>, %arg4: memref<2x8x128xf32, #tpu.memory_space<vmem>>, %arg5: memref<2x8x128xf32, #tpu.memory_space<vmem>>, %arg6: memref<2x8xf32, #tpu.memory_space<vmem>>, %arg7: memref<2x8xf32, #tpu.memory_space<vmem>>) attributes {dimension_semantics = [#tpu.dimension_semantics<parallel>], iteration_bounds = array<i64: 1>, scalar_prefetch = 0 : i64, scratch_operands = 0 : i64, tpu.core_type = #tpu.core_type<tc>, window_params = [{transform_indices = @transform_0, window_bounds = array<i64: 2, 8, 128>}, {pipeline_mode = #tpu.pipeline_mode<synchronous>, transform_indices = @transform_1, window_bounds = array<i64: 1, 128>}, {pipeline_mode = #tpu.pipeline_mode<synchronous>, transform_indices = @transform_2, window_bounds = array<i64: 1, 128>}, {transform_indices = @transform_3, window_bounds = array<i64: 2, 8, 128>}, {transform_indices = @transform_4, window_bounds = array<i64: 2, 8, 128>}, {transform_indices = @transform_5, window_bounds = array<i64: 2, 8>}, {transform_indices = @transform_6, window_bounds = array<i64: 2, 8>}]} {
    %0 = tpu.iota {dimensions = array<i32: 1>} : vector<1x128xi32>
    %c32_i32 = arith.constant 32 : i32
    %1 = vector.broadcast %c32_i32 : i32 to vector<1x128xi32>
    %2 = arith.cmpi slt, %0, %1 : vector<1x128xi32>
    %3 = arith.extui %2 : vector<1x128xi1> to vector<1x128xi32>
    %4 = arith.sitofp %3 : vector<1x128xi32> to vector<1x128xf32>
    %c0 = arith.constant 0 : index
    %c0_0 = arith.constant 0 : index
    %c0_1 = arith.constant 0 : index
    %5 = vector.load %arg1[%c0, %c0_0, %c0_1] : memref<2x8x128xf32, #tpu.memory_space<vmem>>, vector<2x8x128xf32>
    %6 = vector.shape_cast %5 : vector<2x8x128xf32> to vector<16x128xf32>
    %cst = arith.constant dense<0.000000e+00> : vector<16xf32>
    %7 = vector.multi_reduction <add>, %6, %cst [1] : vector<16x128xf32> to vector<16xf32>
    %8 = vector.shape_cast %7 : vector<16xf32> to vector<16x1xf32>
    %cst_2 = arith.constant 3.125000e-02 : f32
    %9 = vector.broadcast %cst_2 : f32 to vector<16x1xf32>
    %10 = arith.mulf %8, %9 : vector<16x1xf32>
    %11 = vector.broadcast %10 : vector<16x1xf32> to vector<16x128xf32>
    %12 = arith.subf %6, %11 : vector<16x128xf32>
    %13 = vector.broadcast %4 : vector<1x128xf32> to vector<16x128xf32>
    %14 = arith.mulf %12, %13 : vector<16x128xf32>
    %15 = arith.mulf %14, %14 : vector<16x128xf32>
    %cst_3 = arith.constant dense<0.000000e+00> : vector<16xf32>
    %16 = vector.multi_reduction <add>, %15, %cst_3 [1] : vector<16x128xf32> to vector<16xf32>
    %17 = vector.shape_cast %16 : vector<16xf32> to vector<16x1xf32>
    %cst_4 = arith.constant 3.125000e-02 : f32
    %18 = vector.broadcast %cst_4 : f32 to vector<16x1xf32>
    %19 = arith.mulf %17, %18 : vector<16x1xf32>
    %cst_5 = arith.constant 9.99999993E-9 : f32
    %20 = vector.broadcast %cst_5 : f32 to vector<16x1xf32>
    %21 = arith.addf %19, %20 : vector<16x1xf32>
    %22 = math.rsqrt %21 : vector<16x1xf32>
    %23 = vector.broadcast %22 : vector<16x1xf32> to vector<16x128xf32>
    %24 = arith.mulf %14, %23 : vector<16x128xf32>
    %c0_6 = arith.constant 0 : index
    %c0_7 = arith.constant 0 : index
    %25 = vector.load %arg2[%c0_6, %c0_7] : memref<1x128xf32, #tpu.memory_space<vmem>>, vector<1x128xf32>
    %26 = vector.broadcast %25 : vector<1x128xf32> to vector<16x128xf32>
    %27 = arith.mulf %24, %26 : vector<16x128xf32>
    %c0_8 = arith.constant 0 : index
    %c0_9 = arith.constant 0 : index
    %28 = vector.load %arg3[%c0_8, %c0_9] : memref<1x128xf32, #tpu.memory_space<vmem>>, vector<1x128xf32>
    %29 = vector.broadcast %28 : vector<1x128xf32> to vector<16x128xf32>
    %30 = arith.addf %27, %29 : vector<16x128xf32>
    %31 = vector.shape_cast %30 : vector<16x128xf32> to vector<2x8x128xf32>
    %c0_10 = arith.constant 0 : index
    %c0_11 = arith.constant 0 : index
    %c0_12 = arith.constant 0 : index
    %32 = vector.load %arg4[%c0_10, %c0_11, %c0_12] : memref<2x8x128xf32, #tpu.memory_space<vmem>>, vector<2x8x128xf32>
    %33 = arith.mulf %31, %32 : vector<2x8x128xf32>
    %cst_13 = arith.constant dense<0.000000e+00> : vector<2x8xf32>
    %34 = vector.multi_reduction <add>, %33, %cst_13 [2] : vector<2x8x128xf32> to vector<2x8xf32>
    %c0_14 = arith.constant 0 : index
    %c0_15 = arith.constant 0 : index
    %35 = vector.load %arg6[%c0_14, %c0_15] : memref<2x8xf32, #tpu.memory_space<vmem>>, vector<2x8xf32>
    tpu.vector_store %arg6[%c0_14, %c0_15], %34 {strides = array<i32>} : memref<2x8xf32, #tpu.memory_space<vmem>>, vector<2x8xf32>,
    %c0_16 = arith.constant 0 : index
    %c0_17 = arith.constant 0 : index
    %c0_18 = arith.constant 0 : index
    %36 = vector.load %arg5[%c0_16, %c0_17, %c0_18] : memref<2x8x128xf32, #tpu.memory_space<vmem>>, vector<2x8x128xf32>
    %37 = arith.mulf %31, %36 : vector<2x8x128xf32>
    %cst_19 = arith.constant dense<0.000000e+00> : vector<2x8xf32>
    %38 = vector.multi_reduction <add>, %37, %cst_19 [2] : vector<2x8x128xf32> to vector<2x8xf32>
    %c0_20 = arith.constant 0 : index
    %c0_21 = arith.constant 0 : index
    %39 = vector.load %arg7[%c0_20, %c0_21] : memref<2x8xf32, #tpu.memory_space<vmem>>, vector<2x8xf32>
    tpu.vector_store %arg7[%c0_20, %c0_21], %38 {strides = array<i32>} : memref<2x8xf32, #tpu.memory_space<vmem>>, vector<2x8xf32>,
    return
  }
  func.func @transform_0(%arg0: i32) -> (i32, i32, i32) {
    %c0_i32 = arith.constant 0 : i32
    %c0_i32_0 = arith.constant 0 : i32
    %c0_i32_1 = arith.constant 0 : i32
    return %arg0, %c0_i32, %c0_i32_0 : i32, i32, i32
  }
  func.func @transform_1(%arg0: i32) -> (i32, i32) {
    %c0_i32 = arith.constant 0 : i32
    %c0_i32_0 = arith.constant 0 : i32
    %c0_i32_1 = arith.constant 0 : i32
    return %c0_i32, %c0_i32_0 : i32, i32
  }
  func.func @transform_2(%arg0: i32) -> (i32, i32) {
    %c0_i32 = arith.constant 0 : i32
    %c0_i32_0 = arith.constant 0 : i32
    %c0_i32_1 = arith.constant 0 : i32
    return %c0_i32, %c0_i32_0 : i32, i32
  }
  func.func @transform_3(%arg0: i32) -> (i32, i32, i32) {
    %c0_i32 = arith.constant 0 : i32
    %c0_i32_0 = arith.constant 0 : i32
    %c0_i32_1 = arith.constant 0 : i32
    return %arg0, %c0_i32, %c0_i32_0 : i32, i32, i32
  }
  func.func @transform_4(%arg0: i32) -> (i32, i32, i32) {
    %c0_i32 = arith.constant 0 : i32
    %c0_i32_0 = arith.constant 0 : i32
    %c0_i32_1 = arith.constant 0 : i32
    return %arg0, %c0_i32, %c0_i32_0 : i32, i32, i32
  }
  func.func @transform_5(%arg0: i32) -> (i32, i32) {
    %c0_i32 = arith.constant 0 : i32
    %c0_i32_0 = arith.constant 0 : i32
    return %arg0, %c0_i32 : i32, i32
  }
  func.func @transform_6(%arg0: i32) -> (i32, i32) {
    %c0_i32 = arith.constant 0 : i32
    %c0_i32_0 = arith.constant 0 : i32
    return %arg0, %c0_i32 : i32, i32
  }
}

module attributes {stable_mosaic.version = 11 : i64} {
  func.func @kernel(%arg0: i32, %arg1: i32, %arg2: memref<2x8x128xf32, #tpu.memory_space<vmem>>, %arg3: memref<2x8xf32, #tpu.memory_space<vmem>>, %arg4: memref<8x8xf32, #tpu.memory_space<vmem>>, %arg5: memref<1x1x128xf32, #tpu.memory_space<vmem>>, %arg6: memref<1x1x128xf32, #tpu.memory_space<vmem>>, %arg7: memref<1x128x256xbf16, #tpu.memory_space<vmem>>, %arg8: memref<1x1x256xf32, #tpu.memory_space<vmem>>, %arg9: memref<1x128x512xbf16, #tpu.memory_space<vmem>>, %arg10: memref<1x1x512xf32, #tpu.memory_space<vmem>>, %arg11: memref<1x256x128xbf16, #tpu.memory_space<vmem>>, %arg12: memref<1x1x128xf32, #tpu.memory_space<vmem>>, %arg13: memref<1x1x128xf32, #tpu.memory_space<vmem>>, %arg14: memref<1x1x128xf32, #tpu.memory_space<vmem>>, %arg15: memref<1x128x128xbf16, #tpu.memory_space<vmem>>, %arg16: memref<1x1x128xf32, #tpu.memory_space<vmem>>, %arg17: memref<1x128x128xbf16, #tpu.memory_space<vmem>>, %arg18: memref<1x1x128xf32, #tpu.memory_space<vmem>>, %arg19: memref<2x8x128xf32, #tpu.memory_space<vmem>>, %arg20: memref<2x8x128xf32, #tpu.memory_space<vmem>>) attributes {dimension_semantics = [#tpu.dimension_semantics<parallel>, #tpu.dimension_semantics<arbitrary>], iteration_bounds = array<i64: 1, 2>, scalar_prefetch = 0 : i64, scratch_operands = 1 : i64, tpu.core_type = #tpu.core_type<tc>, window_params = [{transform_indices = @transform_0, window_bounds = array<i64: 2, 8, 128>}, {transform_indices = @transform_1, window_bounds = array<i64: 2, 8>}, {pipeline_mode = #tpu.pipeline_mode<synchronous>, transform_indices = @transform_2, window_bounds = array<i64: 8, 8>}, {transform_indices = @transform_3, window_bounds = array<i64: 1, 1, 128>}, {transform_indices = @transform_4, window_bounds = array<i64: 1, 1, 128>}, {transform_indices = @transform_5, window_bounds = array<i64: 1, 128, 256>}, {transform_indices = @transform_6, window_bounds = array<i64: 1, 1, 256>}, {transform_indices = @transform_7, window_bounds = array<i64: 1, 128, 512>}, {transform_indices = @transform_8, window_bounds = array<i64: 1, 1, 512>}, {transform_indices = @transform_9, window_bounds = array<i64: 1, 256, 128>}, {transform_indices = @transform_10, window_bounds = array<i64: 1, 1, 128>}, {transform_indices = @transform_11, window_bounds = array<i64: 1, 1, 128>}, {transform_indices = @transform_12, window_bounds = array<i64: 1, 1, 128>}, {transform_indices = @transform_13, window_bounds = array<i64: 1, 128, 128>}, {transform_indices = @transform_14, window_bounds = array<i64: 1, 1, 128>}, {transform_indices = @transform_15, window_bounds = array<i64: 1, 128, 128>}, {transform_indices = @transform_16, window_bounds = array<i64: 1, 1, 128>}, {transform_indices = @transform_17, window_bounds = array<i64: 2, 8, 128>}]} {
    %c0_i32 = arith.constant 0 : i32
    %0 = arith.cmpi eq, %arg1, %c0_i32 : i32
    %1 = arith.extui %0 : i1 to i32
    %c0_i32_0 = arith.constant 0 : i32
    %2 = arith.cmpi ne, %1, %c0_i32_0 : i32
    scf.if %2 {
      %c0_80 = arith.constant 0 : index
      %c0_81 = arith.constant 0 : index
      %c0_82 = arith.constant 0 : index
      %173 = vector.load %arg2[%c0_80, %c0_81, %c0_82] : memref<2x8x128xf32, #tpu.memory_space<vmem>>, vector<2x8x128xf32>
      %c0_83 = arith.constant 0 : index
      %c0_84 = arith.constant 0 : index
      %c0_85 = arith.constant 0 : index
      %174 = vector.load %arg20[%c0_83, %c0_84, %c0_85] : memref<2x8x128xf32, #tpu.memory_space<vmem>>, vector<2x8x128xf32>
      tpu.vector_store %arg20[%c0_83, %c0_84, %c0_85], %173 {strides = array<i32>} : memref<2x8x128xf32, #tpu.memory_space<vmem>>, vector<2x8x128xf32>,
    } else {
    }
    %3 = tpu.iota {dimensions = array<i32: 1>} : vector<1x128xi32>
    %c32_i32 = arith.constant 32 : i32
    %4 = vector.broadcast %c32_i32 : i32 to vector<1x128xi32>
    %5 = arith.cmpi slt, %3, %4 : vector<1x128xi32>
    %6 = arith.extui %5 : vector<1x128xi1> to vector<1x128xi32>
    %7 = arith.sitofp %6 : vector<1x128xi32> to vector<1x128xf32>
    %c0 = arith.constant 0 : index
    %c0_1 = arith.constant 0 : index
    %c0_2 = arith.constant 0 : index
    %8 = vector.load %arg20[%c0, %c0_1, %c0_2] : memref<2x8x128xf32, #tpu.memory_space<vmem>>, vector<2x8x128xf32>
    %9 = vector.shape_cast %8 : vector<2x8x128xf32> to vector<16x128xf32>
    %c0_3 = arith.constant 0 : index
    %c0_4 = arith.constant 0 : index
    %c0_5 = arith.constant 0 : index
    %10 = vector.load %arg5[%c0_3, %c0_4, %c0_5] : memref<1x1x128xf32, #tpu.memory_space<vmem>>, vector<1x1x128xf32>
    %11 = vector.shape_cast %10 : vector<1x1x128xf32> to vector<1x128xf32>
    %c0_6 = arith.constant 0 : index
    %c0_7 = arith.constant 0 : index
    %c0_8 = arith.constant 0 : index
    %12 = vector.load %arg6[%c0_6, %c0_7, %c0_8] : memref<1x1x128xf32, #tpu.memory_space<vmem>>, vector<1x1x128xf32>
    %13 = vector.shape_cast %12 : vector<1x1x128xf32> to vector<1x128xf32>
    %cst = arith.constant dense<0.000000e+00> : vector<16xf32>
    %14 = vector.multi_reduction <add>, %9, %cst [1] : vector<16x128xf32> to vector<16xf32>
    %15 = vector.shape_cast %14 : vector<16xf32> to vector<16x1xf32>
    %cst_9 = arith.constant 3.125000e-02 : f32
    %16 = vector.broadcast %cst_9 : f32 to vector<16x1xf32>
    %17 = arith.mulf %15, %16 : vector<16x1xf32>
    %18 = vector.broadcast %17 : vector<16x1xf32> to vector<16x128xf32>
    %19 = arith.subf %9, %18 : vector<16x128xf32>
    %20 = vector.broadcast %7 : vector<1x128xf32> to vector<16x128xf32>
    %21 = arith.mulf %19, %20 : vector<16x128xf32>
    %22 = arith.mulf %21, %21 : vector<16x128xf32>
    %cst_10 = arith.constant dense<0.000000e+00> : vector<16xf32>
    %23 = vector.multi_reduction <add>, %22, %cst_10 [1] : vector<16x128xf32> to vector<16xf32>
    %24 = vector.shape_cast %23 : vector<16xf32> to vector<16x1xf32>
    %cst_11 = arith.constant 3.125000e-02 : f32
    %25 = vector.broadcast %cst_11 : f32 to vector<16x1xf32>
    %26 = arith.mulf %24, %25 : vector<16x1xf32>
    %cst_12 = arith.constant 9.99999993E-9 : f32
    %27 = vector.broadcast %cst_12 : f32 to vector<16x1xf32>
    %28 = arith.addf %26, %27 : vector<16x1xf32>
    %29 = math.rsqrt %28 : vector<16x1xf32>
    %30 = vector.broadcast %29 : vector<16x1xf32> to vector<16x128xf32>
    %31 = arith.mulf %21, %30 : vector<16x128xf32>
    %32 = vector.broadcast %11 : vector<1x128xf32> to vector<16x128xf32>
    %33 = arith.mulf %31, %32 : vector<16x128xf32>
    %34 = vector.broadcast %13 : vector<1x128xf32> to vector<16x128xf32>
    %35 = arith.addf %33, %34 : vector<16x128xf32>
    %36 = arith.truncf %35 : vector<16x128xf32> to vector<16x128xbf16>
    %c0_13 = arith.constant 0 : index
    %c0_14 = arith.constant 0 : index
    %c0_15 = arith.constant 0 : index
    %37 = vector.load %arg7[%c0_13, %c0_14, %c0_15] : memref<1x128x256xbf16, #tpu.memory_space<vmem>>, vector<1x128x256xbf16>
    %38 = vector.shape_cast %37 : vector<1x128x256xbf16> to vector<128x256xbf16>
    %cst_16 = arith.constant dense<0.000000e+00> : vector<16x256xf32>
    %39 = tpu.matmul %36, %38, %cst_16 {dimension_numbers = #tpu.dot_dimension_numbers<[1], [0], [0], [1], [0, 0, 1, 1], [], []>} : vector<16x128xbf16>, vector<128x256xbf16>, vector<16x256xf32> -> vector<16x256xf32>
    %c0_17 = arith.constant 0 : index
    %c0_18 = arith.constant 0 : index
    %c0_19 = arith.constant 0 : index
    %40 = vector.load %arg8[%c0_17, %c0_18, %c0_19] : memref<1x1x256xf32, #tpu.memory_space<vmem>>, vector<1x1x256xf32>
    %41 = vector.shape_cast %40 : vector<1x1x256xf32> to vector<1x256xf32>
    %42 = vector.broadcast %41 : vector<1x256xf32> to vector<16x256xf32>
    %43 = arith.addf %39, %42 : vector<16x256xf32>
    %44 = arith.truncf %9 : vector<16x128xf32> to vector<16x128xbf16>
    %c0_20 = arith.constant 0 : index
    %c0_21 = arith.constant 0 : index
    %c0_22 = arith.constant 0 : index
    %45 = vector.load %arg9[%c0_20, %c0_21, %c0_22] : memref<1x128x512xbf16, #tpu.memory_space<vmem>>, vector<1x128x512xbf16>
    %46 = vector.shape_cast %45 : vector<1x128x512xbf16> to vector<128x512xbf16>
    %cst_23 = arith.constant dense<0.000000e+00> : vector<16x512xf32>
    %47 = tpu.matmul %44, %46, %cst_23 {dimension_numbers = #tpu.dot_dimension_numbers<[1], [0], [0], [1], [0, 0, 1, 1], [], []>} : vector<16x128xbf16>, vector<128x512xbf16>, vector<16x512xf32> -> vector<16x512xf32>
    %c0_24 = arith.constant 0 : index
    %c0_25 = arith.constant 0 : index
    %c0_26 = arith.constant 0 : index
    %48 = vector.load %arg10[%c0_24, %c0_25, %c0_26] : memref<1x1x512xf32, #tpu.memory_space<vmem>>, vector<1x1x512xf32>
    %49 = vector.shape_cast %48 : vector<1x1x512xf32> to vector<1x512xf32>
    %50 = vector.broadcast %49 : vector<1x512xf32> to vector<16x512xf32>
    %51 = arith.addf %47, %50 : vector<16x512xf32>
    %c0_27 = arith.constant 0 : index
    %c0_28 = arith.constant 0 : index
    %52 = vector.load %arg4[%c0_27, %c0_28] : memref<8x8xf32, #tpu.memory_space<vmem>>, vector<8x8xf32>
    %c0_29 = arith.constant 0 : index
    %c0_30 = arith.constant 0 : index
    %c0_31 = arith.constant 0 : index
    %53 = vector.load %arg11[%c0_29, %c0_30, %c0_31] : memref<1x256x128xbf16, #tpu.memory_space<vmem>>, vector<1x256x128xbf16>
    %54 = vector.shape_cast %53 : vector<1x256x128xbf16> to vector<256x128xbf16>
    %cst_32 = arith.constant 0.000000e+00 : f32
    %55 = vector.broadcast %cst_32 : f32 to vector<16x128xf32>
    %56 = vector.extract_strided_slice %43 {offsets = [0, 0], sizes = [16, 128], strides = [1, 1]} : vector<16x256xf32> to vector<16x128xf32>
    %57 = vector.shape_cast %56 : vector<16x128xf32> to vector<2x8x128xf32>
    %58 = arith.truncf %57 : vector<2x8x128xf32> to vector<2x8x128xbf16>
    %59 = vector.extract_strided_slice %51 {offsets = [0, 0], sizes = [16, 128], strides = [1, 1]} : vector<16x512xf32> to vector<16x128xf32>
    %60 = vector.shape_cast %59 : vector<16x128xf32> to vector<2x8x128xf32>
    %61 = arith.truncf %60 : vector<2x8x128xf32> to vector<2x8x128xbf16>
    %62 = vector.extract_strided_slice %51 {offsets = [0, 256], sizes = [16, 128], strides = [1, 1]} : vector<16x512xf32> to vector<16x128xf32>
    %63 = vector.shape_cast %62 : vector<16x128xf32> to vector<2x8x128xf32>
    %64 = arith.truncf %63 : vector<2x8x128xf32> to vector<2x8x128xbf16>
    "tpu.trace_start"() <{level = 10 : i32, message = "bqd,bkd->bqk"}> : () -> ()
    %cst_33 = arith.constant dense<0.000000e+00> : vector<2x8x8xf32>
    %65 = tpu.matmul %58, %61, %cst_33 {dimension_numbers = #tpu.dot_dimension_numbers<[2], [2], [1], [1], [0, 0, 0, 1, 1, 1], [0], [0]>} : vector<2x8x128xbf16>, vector<2x8x128xbf16>, vector<2x8x8xf32> -> vector<2x8x8xf32>
    "tpu.trace_stop"() : () -> ()
    %66 = vector.shape_cast %52 : vector<8x8xf32> to vector<1x8x8xf32>
    %67 = vector.broadcast %66 : vector<1x8x8xf32> to vector<2x8x8xf32>
    %68 = arith.addf %65, %67 : vector<2x8x8xf32>
    %cst_34 = arith.constant dense<0xFF800000> : vector<2x8xf32>
    %69 = vector.multi_reduction <maximumf>, %68, %cst_34 [2] : vector<2x8x8xf32> to vector<2x8xf32>
    %70 = vector.shape_cast %69 : vector<2x8xf32> to vector<2x8x1xf32>
    %71 = vector.broadcast %70 : vector<2x8x1xf32> to vector<2x8x8xf32>
    %72 = arith.subf %68, %71 : vector<2x8x8xf32>
    %73 = math.exp %72 : vector<2x8x8xf32>
    %cst_35 = arith.constant dense<0.000000e+00> : vector<2x8xf32>
    %74 = vector.multi_reduction <add>, %73, %cst_35 [2] : vector<2x8x8xf32> to vector<2x8xf32>
    %75 = vector.shape_cast %74 : vector<2x8xf32> to vector<2x8x1xf32>
    %76 = tpu.reciprocal %75 {approx = true} : vector<2x8x1xf32> -> vector<2x8x1xf32>
    %77 = vector.broadcast %76 : vector<2x8x1xf32> to vector<2x8x8xf32>
    %78 = arith.mulf %73, %77 : vector<2x8x8xf32>
    %79 = arith.truncf %78 : vector<2x8x8xf32> to vector<2x8x8xbf16>
    "tpu.trace_start"() <{level = 10 : i32, message = "bqk,bkd->bqd"}> : () -> ()
    %cst_36 = arith.constant dense<0.000000e+00> : vector<2x8x128xf32>
    %80 = tpu.matmul %79, %64, %cst_36 {dimension_numbers = #tpu.dot_dimension_numbers<[2], [1], [1], [2], [0, 0, 0, 1, 1, 2], [0], [0]>} : vector<2x8x8xbf16>, vector<2x8x128xbf16>, vector<2x8x128xf32> -> vector<2x8x128xf32>
    "tpu.trace_stop"() : () -> ()
    %81 = vector.shape_cast %80 : vector<2x8x128xf32> to vector<16x128xf32>
    %82 = arith.truncf %81 : vector<16x128xf32> to vector<16x128xbf16>
    %83 = vector.extract_strided_slice %54 {offsets = [0, 0], sizes = [128, 128], strides = [1, 1]} : vector<256x128xbf16> to vector<128x128xbf16>
    %cst_37 = arith.constant dense<0.000000e+00> : vector<16x128xf32>
    %84 = tpu.matmul %82, %83, %cst_37 {dimension_numbers = #tpu.dot_dimension_numbers<[1], [0], [0], [1], [0, 0, 1, 1], [], []>} : vector<16x128xbf16>, vector<128x128xbf16>, vector<16x128xf32> -> vector<16x128xf32>
    %85 = arith.addf %55, %84 : vector<16x128xf32>
    %86 = vector.extract_strided_slice %43 {offsets = [0, 128], sizes = [16, 128], strides = [1, 1]} : vector<16x256xf32> to vector<16x128xf32>
    %87 = vector.shape_cast %86 : vector<16x128xf32> to vector<2x8x128xf32>
    %88 = arith.truncf %87 : vector<2x8x128xf32> to vector<2x8x128xbf16>
    %89 = vector.extract_strided_slice %51 {offsets = [0, 128], sizes = [16, 128], strides = [1, 1]} : vector<16x512xf32> to vector<16x128xf32>
    %90 = vector.shape_cast %89 : vector<16x128xf32> to vector<2x8x128xf32>
    %91 = arith.truncf %90 : vector<2x8x128xf32> to vector<2x8x128xbf16>
    %92 = vector.extract_strided_slice %51 {offsets = [0, 384], sizes = [16, 128], strides = [1, 1]} : vector<16x512xf32> to vector<16x128xf32>
    %93 = vector.shape_cast %92 : vector<16x128xf32> to vector<2x8x128xf32>
    %94 = arith.truncf %93 : vector<2x8x128xf32> to vector<2x8x128xbf16>
    "tpu.trace_start"() <{level = 10 : i32, message = "bqd,bkd->bqk"}> : () -> ()
    %cst_38 = arith.constant dense<0.000000e+00> : vector<2x8x8xf32>
    %95 = tpu.matmul %88, %91, %cst_38 {dimension_numbers = #tpu.dot_dimension_numbers<[2], [2], [1], [1], [0, 0, 0, 1, 1, 1], [0], [0]>} : vector<2x8x128xbf16>, vector<2x8x128xbf16>, vector<2x8x8xf32> -> vector<2x8x8xf32>
    "tpu.trace_stop"() : () -> ()
    %96 = vector.shape_cast %52 : vector<8x8xf32> to vector<1x8x8xf32>
    %97 = vector.broadcast %96 : vector<1x8x8xf32> to vector<2x8x8xf32>
    %98 = arith.addf %95, %97 : vector<2x8x8xf32>
    %cst_39 = arith.constant dense<0xFF800000> : vector<2x8xf32>
    %99 = vector.multi_reduction <maximumf>, %98, %cst_39 [2] : vector<2x8x8xf32> to vector<2x8xf32>
    %100 = vector.shape_cast %99 : vector<2x8xf32> to vector<2x8x1xf32>
    %101 = vector.broadcast %100 : vector<2x8x1xf32> to vector<2x8x8xf32>
    %102 = arith.subf %98, %101 : vector<2x8x8xf32>
    %103 = math.exp %102 : vector<2x8x8xf32>
    %cst_40 = arith.constant dense<0.000000e+00> : vector<2x8xf32>
    %104 = vector.multi_reduction <add>, %103, %cst_40 [2] : vector<2x8x8xf32> to vector<2x8xf32>
    %105 = vector.shape_cast %104 : vector<2x8xf32> to vector<2x8x1xf32>
    %106 = tpu.reciprocal %105 {approx = true} : vector<2x8x1xf32> -> vector<2x8x1xf32>
    %107 = vector.broadcast %106 : vector<2x8x1xf32> to vector<2x8x8xf32>
    %108 = arith.mulf %103, %107 : vector<2x8x8xf32>
    %109 = arith.truncf %108 : vector<2x8x8xf32> to vector<2x8x8xbf16>
    "tpu.trace_start"() <{level = 10 : i32, message = "bqk,bkd->bqd"}> : () -> ()
    %cst_41 = arith.constant dense<0.000000e+00> : vector<2x8x128xf32>
    %110 = tpu.matmul %109, %94, %cst_41 {dimension_numbers = #tpu.dot_dimension_numbers<[2], [1], [1], [2], [0, 0, 0, 1, 1, 2], [0], [0]>} : vector<2x8x8xbf16>, vector<2x8x128xbf16>, vector<2x8x128xf32> -> vector<2x8x128xf32>
    "tpu.trace_stop"() : () -> ()
    %111 = vector.shape_cast %110 : vector<2x8x128xf32> to vector<16x128xf32>
    %112 = arith.truncf %111 : vector<16x128xf32> to vector<16x128xbf16>
    %113 = vector.extract_strided_slice %54 {offsets = [128, 0], sizes = [128, 128], strides = [1, 1]} : vector<256x128xbf16> to vector<128x128xbf16>
    %cst_42 = arith.constant dense<0.000000e+00> : vector<16x128xf32>
    %114 = tpu.matmul %112, %113, %cst_42 {dimension_numbers = #tpu.dot_dimension_numbers<[1], [0], [0], [1], [0, 0, 1, 1], [], []>} : vector<16x128xbf16>, vector<128x128xbf16>, vector<16x128xf32> -> vector<16x128xf32>
    %115 = arith.addf %85, %114 : vector<16x128xf32>
    %c0_43 = arith.constant 0 : index
    %c0_44 = arith.constant 0 : index
    %c0_45 = arith.constant 0 : index
    %116 = vector.load %arg12[%c0_43, %c0_44, %c0_45] : memref<1x1x128xf32, #tpu.memory_space<vmem>>, vector<1x1x128xf32>
    %117 = vector.shape_cast %116 : vector<1x1x128xf32> to vector<1x128xf32>
    %118 = vector.broadcast %117 : vector<1x128xf32> to vector<16x128xf32>
    %119 = arith.addf %115, %118 : vector<16x128xf32>
    %120 = arith.addf %35, %119 : vector<16x128xf32>
    %c0_46 = arith.constant 0 : index
    %c0_47 = arith.constant 0 : index
    %c0_48 = arith.constant 0 : index
    %121 = vector.load %arg13[%c0_46, %c0_47, %c0_48] : memref<1x1x128xf32, #tpu.memory_space<vmem>>, vector<1x1x128xf32>
    %122 = vector.shape_cast %121 : vector<1x1x128xf32> to vector<1x128xf32>
    %c0_49 = arith.constant 0 : index
    %c0_50 = arith.constant 0 : index
    %c0_51 = arith.constant 0 : index
    %123 = vector.load %arg14[%c0_49, %c0_50, %c0_51] : memref<1x1x128xf32, #tpu.memory_space<vmem>>, vector<1x1x128xf32>
    %124 = vector.shape_cast %123 : vector<1x1x128xf32> to vector<1x128xf32>
    %cst_52 = arith.constant dense<0.000000e+00> : vector<16xf32>
    %125 = vector.multi_reduction <add>, %120, %cst_52 [1] : vector<16x128xf32> to vector<16xf32>
    %126 = vector.shape_cast %125 : vector<16xf32> to vector<16x1xf32>
    %cst_53 = arith.constant 3.125000e-02 : f32
    %127 = vector.broadcast %cst_53 : f32 to vector<16x1xf32>
    %128 = arith.mulf %126, %127 : vector<16x1xf32>
    %129 = vector.broadcast %128 : vector<16x1xf32> to vector<16x128xf32>
    %130 = arith.subf %120, %129 : vector<16x128xf32>
    %131 = vector.broadcast %7 : vector<1x128xf32> to vector<16x128xf32>
    %132 = arith.mulf %130, %131 : vector<16x128xf32>
    %133 = arith.mulf %132, %132 : vector<16x128xf32>
    %cst_54 = arith.constant dense<0.000000e+00> : vector<16xf32>
    %134 = vector.multi_reduction <add>, %133, %cst_54 [1] : vector<16x128xf32> to vector<16xf32>
    %135 = vector.shape_cast %134 : vector<16xf32> to vector<16x1xf32>
    %cst_55 = arith.constant 3.125000e-02 : f32
    %136 = vector.broadcast %cst_55 : f32 to vector<16x1xf32>
    %137 = arith.mulf %135, %136 : vector<16x1xf32>
    %cst_56 = arith.constant 9.99999993E-9 : f32
    %138 = vector.broadcast %cst_56 : f32 to vector<16x1xf32>
    %139 = arith.addf %137, %138 : vector<16x1xf32>
    %140 = math.rsqrt %139 : vector<16x1xf32>
    %141 = vector.broadcast %140 : vector<16x1xf32> to vector<16x128xf32>
    %142 = arith.mulf %132, %141 : vector<16x128xf32>
    %143 = vector.broadcast %122 : vector<1x128xf32> to vector<16x128xf32>
    %144 = arith.mulf %142, %143 : vector<16x128xf32>
    %145 = vector.broadcast %124 : vector<1x128xf32> to vector<16x128xf32>
    %146 = arith.addf %144, %145 : vector<16x128xf32>
    %147 = arith.truncf %146 : vector<16x128xf32> to vector<16x128xbf16>
    %c0_57 = arith.constant 0 : index
    %c0_58 = arith.constant 0 : index
    %c0_59 = arith.constant 0 : index
    %148 = vector.load %arg15[%c0_57, %c0_58, %c0_59] : memref<1x128x128xbf16, #tpu.memory_space<vmem>>, vector<1x128x128xbf16>
    %149 = vector.shape_cast %148 : vector<1x128x128xbf16> to vector<128x128xbf16>
    %cst_60 = arith.constant dense<0.000000e+00> : vector<16x128xf32>
    %150 = tpu.matmul %147, %149, %cst_60 {dimension_numbers = #tpu.dot_dimension_numbers<[1], [0], [0], [1], [0, 0, 1, 1], [], []>} : vector<16x128xbf16>, vector<128x128xbf16>, vector<16x128xf32> -> vector<16x128xf32>
    %c0_61 = arith.constant 0 : index
    %c0_62 = arith.constant 0 : index
    %c0_63 = arith.constant 0 : index
    %151 = vector.load %arg16[%c0_61, %c0_62, %c0_63] : memref<1x1x128xf32, #tpu.memory_space<vmem>>, vector<1x1x128xf32>
    %152 = vector.shape_cast %151 : vector<1x1x128xf32> to vector<1x128xf32>
    %153 = vector.broadcast %152 : vector<1x128xf32> to vector<16x128xf32>
    %154 = arith.addf %150, %153 : vector<16x128xf32>
    %cst_64 = arith.constant 0.000000e+00 : f32
    %155 = vector.broadcast %cst_64 : f32 to vector<16x128xf32>
    %156 = arith.maximumf %154, %155 : vector<16x128xf32>
    %157 = arith.truncf %156 : vector<16x128xf32> to vector<16x128xbf16>
    %c0_65 = arith.constant 0 : index
    %c0_66 = arith.constant 0 : index
    %c0_67 = arith.constant 0 : index
    %158 = vector.load %arg17[%c0_65, %c0_66, %c0_67] : memref<1x128x128xbf16, #tpu.memory_space<vmem>>, vector<1x128x128xbf16>
    %159 = vector.shape_cast %158 : vector<1x128x128xbf16> to vector<128x128xbf16>
    %cst_68 = arith.constant dense<0.000000e+00> : vector<16x128xf32>
    %160 = tpu.matmul %157, %159, %cst_68 {dimension_numbers = #tpu.dot_dimension_numbers<[1], [0], [0], [1], [0, 0, 1, 1], [], []>} : vector<16x128xbf16>, vector<128x128xbf16>, vector<16x128xf32> -> vector<16x128xf32>
    %c0_69 = arith.constant 0 : index
    %c0_70 = arith.constant 0 : index
    %c0_71 = arith.constant 0 : index
    %161 = vector.load %arg18[%c0_69, %c0_70, %c0_71] : memref<1x1x128xf32, #tpu.memory_space<vmem>>, vector<1x1x128xf32>
    %162 = vector.shape_cast %161 : vector<1x1x128xf32> to vector<1x128xf32>
    %163 = vector.broadcast %162 : vector<1x128xf32> to vector<16x128xf32>
    %164 = arith.addf %160, %163 : vector<16x128xf32>
    %165 = arith.addf %146, %164 : vector<16x128xf32>
    %166 = vector.shape_cast %165 : vector<16x128xf32> to vector<2x8x128xf32>
    %c0_72 = arith.constant 0 : index
    %c0_73 = arith.constant 0 : index
    %167 = vector.load %arg3[%c0_72, %c0_73] : memref<2x8xf32, #tpu.memory_space<vmem>>, vector<2x8xf32>
    %168 = vector.shape_cast %167 : vector<2x8xf32> to vector<2x8x1xf32>
    %169 = vector.broadcast %168 : vector<2x8x1xf32> to vector<2x8x128xf32>
    %170 = arith.mulf %166, %169 : vector<2x8x128xf32>
    %c0_74 = arith.constant 0 : index
    %c0_75 = arith.constant 0 : index
    %c0_76 = arith.constant 0 : index
    %171 = vector.load %arg20[%c0_74, %c0_75, %c0_76] : memref<2x8x128xf32, #tpu.memory_space<vmem>>, vector<2x8x128xf32>
    tpu.vector_store %arg20[%c0_74, %c0_75, %c0_76], %170 {strides = array<i32>} : memref<2x8x128xf32, #tpu.memory_space<vmem>>, vector<2x8x128xf32>,
    %c0_77 = arith.constant 0 : index
    %c0_78 = arith.constant 0 : index
    %c0_79 = arith.constant 0 : index
    %172 = vector.load %arg19[%c0_77, %c0_78, %c0_79] : memref<2x8x128xf32, #tpu.memory_space<vmem>>, vector<2x8x128xf32>
    tpu.vector_store %arg19[%c0_77, %c0_78, %c0_79], %170 {strides = array<i32>} : memref<2x8x128xf32, #tpu.memory_space<vmem>>, vector<2x8x128xf32>,
    return
  }
  func.func @transform_0(%arg0: i32, %arg1: i32) -> (i32, i32, i32) {
    %c0_i32 = arith.constant 0 : i32
    %c0_i32_0 = arith.constant 0 : i32
    %c0_i32_1 = arith.constant 0 : i32
    return %arg0, %c0_i32, %c0_i32_0 : i32, i32, i32
  }
  func.func @transform_1(%arg0: i32, %arg1: i32) -> (i32, i32) {
    %c0_i32 = arith.constant 0 : i32
    %c0_i32_0 = arith.constant 0 : i32
    return %arg0, %c0_i32 : i32, i32
  }
  func.func @transform_2(%arg0: i32, %arg1: i32) -> (i32, i32) {
    %c0_i32 = arith.constant 0 : i32
    %c0_i32_0 = arith.constant 0 : i32
    %c0_i32_1 = arith.constant 0 : i32
    return %c0_i32, %c0_i32_0 : i32, i32
  }
  func.func @transform_3(%arg0: i32, %arg1: i32) -> (i32, i32, i32) {
    %c0_i32 = arith.constant 0 : i32
    %c0_i32_0 = arith.constant 0 : i32
    %c0_i32_1 = arith.constant 0 : i32
    return %arg1, %c0_i32, %c0_i32_0 : i32, i32, i32
  }
  func.func @transform_4(%arg0: i32, %arg1: i32) -> (i32, i32, i32) {
    %c0_i32 = arith.constant 0 : i32
    %c0_i32_0 = arith.constant 0 : i32
    %c0_i32_1 = arith.constant 0 : i32
    return %arg1, %c0_i32, %c0_i32_0 : i32, i32, i32
  }
  func.func @transform_5(%arg0: i32, %arg1: i32) -> (i32, i32, i32) {
    %c0_i32 = arith.constant 0 : i32
    %c0_i32_0 = arith.constant 0 : i32
    %c0_i32_1 = arith.constant 0 : i32
    return %arg1, %c0_i32, %c0_i32_0 : i32, i32, i32
  }
  func.func @transform_6(%arg0: i32, %arg1: i32) -> (i32, i32, i32) {
    %c0_i32 = arith.constant 0 : i32
    %c0_i32_0 = arith.constant 0 : i32
    %c0_i32_1 = arith.constant 0 : i32
    return %arg1, %c0_i32, %c0_i32_0 : i32, i32, i32
  }
  func.func @transform_7(%arg0: i32, %arg1: i32) -> (i32, i32, i32) {
    %c0_i32 = arith.constant 0 : i32
    %c0_i32_0 = arith.constant 0 : i32
    %c0_i32_1 = arith.constant 0 : i32
    return %arg1, %c0_i32, %c0_i32_0 : i32, i32, i32
  }
  func.func @transform_8(%arg0: i32, %arg1: i32) -> (i32, i32, i32) {
    %c0_i32 = arith.constant 0 : i32
    %c0_i32_0 = arith.constant 0 : i32
    %c0_i32_1 = arith.constant 0 : i32
    return %arg1, %c0_i32, %c0_i32_0 : i32, i32, i32
  }
  func.func @transform_9(%arg0: i32, %arg1: i32) -> (i32, i32, i32) {
    %c0_i32 = arith.constant 0 : i32
    %c0_i32_0 = arith.constant 0 : i32
    %c0_i32_1 = arith.constant 0 : i32
    return %arg1, %c0_i32, %c0_i32_0 : i32, i32, i32
  }
  func.func @transform_10(%arg0: i32, %arg1: i32) -> (i32, i32, i32) {
    %c0_i32 = arith.constant 0 : i32
    %c0_i32_0 = arith.constant 0 : i32
    %c0_i32_1 = arith.constant 0 : i32
    return %arg1, %c0_i32, %c0_i32_0 : i32, i32, i32
  }
  func.func @transform_11(%arg0: i32, %arg1: i32) -> (i32, i32, i32) {
    %c0_i32 = arith.constant 0 : i32
    %c0_i32_0 = arith.constant 0 : i32
    %c0_i32_1 = arith.constant 0 : i32
    return %arg1, %c0_i32, %c0_i32_0 : i32, i32, i32
  }
  func.func @transform_12(%arg0: i32, %arg1: i32) -> (i32, i32, i32) {
    %c0_i32 = arith.constant 0 : i32
    %c0_i32_0 = arith.constant 0 : i32
    %c0_i32_1 = arith.constant 0 : i32
    return %arg1, %c0_i32, %c0_i32_0 : i32, i32, i32
  }
  func.func @transform_13(%arg0: i32, %arg1: i32) -> (i32, i32, i32) {
    %c0_i32 = arith.constant 0 : i32
    %c0_i32_0 = arith.constant 0 : i32
    %c0_i32_1 = arith.constant 0 : i32
    return %arg1, %c0_i32, %c0_i32_0 : i32, i32, i32
  }
  func.func @transform_14(%arg0: i32, %arg1: i32) -> (i32, i32, i32) {
    %c0_i32 = arith.constant 0 : i32
    %c0_i32_0 = arith.constant 0 : i32
    %c0_i32_1 = arith.constant 0 : i32
    return %arg1, %c0_i32, %c0_i32_0 : i32, i32, i32
  }
  func.func @transform_15(%arg0: i32, %arg1: i32) -> (i32, i32, i32) {
    %c0_i32 = arith.constant 0 : i32
    %c0_i32_0 = arith.constant 0 : i32
    %c0_i32_1 = arith.constant 0 : i32
    return %arg1, %c0_i32, %c0_i32_0 : i32, i32, i32
  }
  func.func @transform_16(%arg0: i32, %arg1: i32) -> (i32, i32, i32) {
    %c0_i32 = arith.constant 0 : i32
    %c0_i32_0 = arith.constant 0 : i32
    %c0_i32_1 = arith.constant 0 : i32
    return %arg1, %c0_i32, %c0_i32_0 : i32, i32, i32
  }
  func.func @transform_17(%arg0: i32, %arg1: i32) -> (i32, i32, i32) {
    %c0_i32 = arith.constant 0 : i32
    %c0_i32_0 = arith.constant 0 : i32
    %c0_i32_1 = arith.constant 0 : i32
    return %arg0, %c0_i32, %c0_i32_0 : i32, i32, i32
  }
}

</mosaic_0001>

<bundles_post_ra>
// kernel: sasrec_forward.3
= control target key start
LH: loop header
LB: loop body
LE: loop exit
PB: predicated region body
PF: predicated region fallthrough
CT: control target
= control target key end

     0   :  { %12 = vsyncpa [#allocation3], 0  ;;  %s277_s0 = inlined_call_operand.vmem [shape: f32[2,8,128], index: 0, kind: input, shape index: {}]   ;;  %s278_s1 = inlined_call_operand.vmem [shape: f32[1,128], index: 1, kind: input, shape index: {}]   ;;  %s279_s2 = inlined_call_operand.vmem [shape: f32[1,128], index: 2, kind: input, shape index: {}]   ;;  %s280_s3 = inlined_call_operand.vmem [shape: f32[2,8,128], index: 3, kind: input, shape index: {}]   ;;  %s281_s4 = inlined_call_operand.vmem [shape: f32[2,8,128], index: 4, kind: input, shape index: {}]   ;;  %s282_s5 = inlined_call_operand.hbm [shape: f32[2,8], index: 5, kind: output, shape index: {0}]   ;;  %s283_s6 = inlined_call_operand.hbm [shape: f32[2,8], index: 6, kind: output, shape index: {1}]  }
   0x1   :  { %v29_v0 = vld [vmem:[%s277_s0] sm:$0xff] }
   0x2   :  { %13 = vsyncpa [#allocation5], 0  ;;  %31 = vadd.xlane.f32.xlu0 %v29_v0  ;;  %v30_v1 = vld [vmem:[%s277_s0 + $0x8] sm:$0xff]  ;;  %v24_v2 = vlaneseq  ;;  %v199_v8 = vmov 0.0   ;;  %v146_v25 = vld [vmem:[%s278_s1] ss:$0 sm:$0xff] }
   0x3   :  { %v147_v27 = vld [vmem:[%s279_s2] ss:$0 sm:$0xff]  ;;  %v74_v36 = vld [vmem:[%s280_s3 + $0x8] sm:$0xff]  ;;  %s200_s10 = smov [#allocation2]   ;;  %vm91_vm1 = vcmask 1041409   ;;  %vm94_vm2 = vcmask 58368  }
   0x4   :  { %v25_v3 = vand.u32 127, %v24_v2  ;;  %v84_v4 = vshrl.u32 %v24_v2, 7  ;;  %v73_v30 = vld [vmem:[%s280_s3] sm:$0xff]  ;;  %v97_v40 = vld [vmem:[%s281_s4 + $0x8] sm:$0xff]  ;;  %s123_s11 = sshll.u32 %s200_s10, 4  ;;  %s201_s3 = smov [#allocation4]   ;;  %s124_s11 = int_to_ptr.vmem [resolvable:$true] %s123_s11 }
   0x5   :  { %v96_v35 = vld [vmem:[%s281_s4] sm:$0xff]  ;;  %s133_s4 = sshll.u32 %s201_s3, 4  ;;  %s155_s12 = scalar_lea.vmem %s124_s11, 32  ;;  %s134_s4 = int_to_ptr.vmem [resolvable:$true] %s133_s4 }
   0x6   :  { %33 = vadd.xlane.f32.xlu0 %v30_v1  ;;  %v243_v5 = vsub.s32 %v25_v3, %v84_v4  ;;  %vm26_vm0 = vcmp.lt.s32.totalorder %v25_v3, 32  ;;  %p156_p0 = scmp.ne.s32.totalorder %s124_s11, %s155_s12  ;;  %p160_p1 = scmp.lt.s32.totalorder %s124_s11, %s124_s11 }
   0x7   :  { %v145_v9 = vsel %vm26_vm0, 1.0, %v199_v8  ;;  %p161_p2 = scmp.lt.s32.totalorder %s155_s12, %s155_s12 }
   0x9   :  { %p162_p3 = por %p161_p2, %p160_p1 }
   0xb   :  { %p163_p4 = pnand %p162_p3, %p156_p0 }
  0x8b   :  { %v32_v6 = vpop.xlane.xlu0 %31 }
  0x8c   :  { %v35_v7 = vmul.f32 0.03125, %v32_v6 }
  0x8e   :  { %v37_v10 = vsub.f32 %v29_v0, %v35_v7 }
  0x8f   :  { %v34_v11 = vpop.xlane.xlu0 %33 }
  0x90   :  { %v36_v12 = vmul.f32 0.03125, %v34_v11  ;;  %v39_v13 = vmul.f32 %v145_v9, %v37_v10 }
  0x92   :  { %v38_v14 = vsub.f32 %v30_v1, %v36_v12  ;;  %v41_v15 = vmul.f32 %v39_v13, %v39_v13 }
  0x94   :  { %43 = vadd.xlane.f32.xlu1 %v41_v15  ;;  %v40_v16 = vmul.f32 %v145_v9, %v38_v14 }
  0x96   :  { %v42_v17 = vmul.f32 %v40_v16, %v40_v16 }
  0x98   :  { %45 = vadd.xlane.f32.xlu1 %v42_v17 }
 0x11d   :  { %v44_v18 = vpop.xlane.xlu1 %43 }
 0x11e   :  { %v47_v19 = vmul.f32 0.03125, %v44_v18 }
 0x120   :  { %v49_v20 = vadd.f32 1e-08, %v47_v19 }
 0x121   :  { %v46_v21 = vpop.xlane.xlu1 %45 }
 0x122   :  { %151 = vrsqrt.f32 %v49_v20  ;;  %v48_v22 = vmul.f32 0.03125, %v46_v21 }
 0x124   :  { %v50_v23 = vadd.f32 1e-08, %v48_v22 }
 0x126   :  { %153 = vrsqrt.f32 %v50_v23 }
 0x12f   :  { %v152_v24 = vpop.eup %151 }
 0x130   :  { %v53_v26 = vmul.f32 %v152_v24, %v39_v13 }
 0x132   :  { %v62_v28 = vmul.f32 %v146_v25, %v53_v26 }
 0x133   :  { %v154_v29 = vpop.eup %153 }
 0x134   :  { %v71_v31 = vadd.f32 %v147_v27, %v62_v28  ;;  %v54_v32 = vmul.f32 %v154_v29, %v40_v16 }
 0x136   :  { %v75_v33 = vmul.f32 %v73_v30, %v71_v31  ;;  %v63_v34 = vmul.f32 %v146_v25, %v54_v32  ;;  %v98_v38 = vmul.f32 %v96_v35, %v71_v31 }
 0x138   :  { %77 = vadd.xlane.f32.xlu0 %v75_v33  ;;  %v72_v37 = vadd.f32 %v147_v27, %v63_v34 }
 0x13a   :  { %v76_v39 = vmul.f32 %v74_v36, %v72_v37  ;;  %v99_v41 = vmul.f32 %v97_v40, %v72_v37 }
 0x13c   :  { %100 = vadd.xlane.f32.xlu0 %v98_v38  ;;  %79 = vadd.xlane.f32.xlu1 %v76_v39 }
 0x140   :  { %102 = vadd.xlane.f32.xlu1 %v99_v41 }
 0x1c1   :  { %v78_v42 = vpop.xlane.xlu0 %77 }
 0x1c2   :  { %v86_v44 = vrot.slane %v78_v42, %v243_v5 }
 0x1c5   :  { %v80_v43 = vpop.xlane.xlu1 %79  ;;  %v101_v46 = vpop.xlane.xlu0 %100 }
 0x1c6   :  { %v90_v45 = vrot.slane %v80_v43, %v243_v5  ;;  %v109_v49 = vrot.slane %v101_v46, %v243_v5 }
 0x1c8   :  { %v92_v47 = vsel %vm91_vm1, %v90_v45, %v86_v44 }
 0x1c9   :  { %v103_v48 = vpop.xlane.xlu1 %102  ;;  %95 = vst.msk [vmem:[#allocation2] sm:$0x3] %vm94_vm2, %v92_v47 }
 0x1ca   :  { %v113_v50 = vrot.slane %v103_v48, %v243_v5 }
 0x1cb   :  { %166 = shalt.err (!%p163_p4)
}
 0x1cc   :  { %126 = dma.vmem_to_hbm [thread:$0]  %s124_s11, 32, %s282_s5, [#allocation3]   ;;  %v114_v51 = vsel %vm91_vm1, %v113_v50, %v109_v49 }
 0x1cd   :  { %116 = vst.msk [vmem:[#allocation4] sm:$0x3] %vm94_vm2, %v114_v51  ;;  %s175_s15 = scalar_lea.vmem %s134_s4, 32  ;;  %p180_p6 = scmp.lt.s32.totalorder %s134_s4, %s134_s4 }
 0x1ce   :  { %p176_p5 = scmp.ne.s32.totalorder %s134_s4, %s175_s15  ;;  %p181_p7 = scmp.lt.s32.totalorder %s175_s15, %s175_s15 }
 0x1d0   :  { %p182_p8 = por %p181_p7, %p180_p6 }
 0x1d2   :  { %p183_p9 = pnand %p182_p8, %p176_p5 }
 0x1d4   :  { %186 = shalt.err (!%p183_p9)
}
 0x1d5   :  { %136 = dma.vmem_to_hbm [thread:$0]  %s134_s4, 32, %s283_s6, [#allocation5]  }
 0x1d6   :  { %195 = dma.done.wait [#allocation3], 32  }
 0x1d7   :  { %196 = vsyncadd [#allocation3], 4294967264 }
 0x1d8   :  { %197 = dma.done.wait [#allocation5], 32  }
 0x1d9   :  { %198 = vsyncadd [#allocation5], 4294967264 }
 0x1da   :  { %143 = vsyncpa [#allocation3], 1 }
 0x1db   :  { %144 = vsyncpa [#allocation5], 1 }

// kernel: sasrec_forward.2
= control target key start
LH: loop header
LB: loop body
LE: loop exit
PB: predicated region body
PF: predicated region fallthrough
CT: control target
= control target key end

     0   :  { %s3046_s24 = smov 0   ;;  %s3048_s25 = smov 0   ;;  %s3443_s0 = inlined_call_operand.vmem [shape: f32[2,8,128], index: 0, kind: input, shape index: {}]   ;;  %s3444_s1 = inlined_call_operand.vmem [shape: f32[2,8], index: 1, kind: input, shape index: {}]   ;;  %s3445_s2 = inlined_call_operand.vmem [shape: f32[8,8], index: 2, kind: input, shape index: {}]   ;;  %s3446_s3 = inlined_call_operand.vmem [shape: f32[2,1,128], index: 3, kind: input, shape index: {}]   ;;  %s3447_s4 = inlined_call_operand.vmem [shape: f32[2,1,128], index: 4, kind: input, shape index: {}]   ;;  %s3448_s5 = inlined_call_operand.vmem [shape: bf16[2,128,256], index: 5, kind: input, shape index: {}]   ;;  %s3449_s6 = inlined_call_operand.vmem [shape: f32[2,1,256], index: 6, kind: input, shape index: {}]   ;;  %s3450_s7 = inlined_call_operand.vmem [shape: bf16[2,128,512], index: 7, kind: input, shape index: {}]   ;;  %s3451_s8 = inlined_call_operand.vmem [shape: f32[2,1,512], index: 8, kind: input, shape index: {}]   ;;  %s3452_s9 = inlined_call_operand.vmem [shape: bf16[2,256,128], index: 9, kind: input, shape index: {}]   ;;  %s3453_s10 = inlined_call_operand.vmem [shape: f32[2,1,128], index: 10, kind: input, shape index: {}]   ;;  %s3454_s11 = inlined_call_operand.vmem [shape: f32[2,1,128], index: 11, kind: input, shape index: {}]   ;;  %s3455_s12 = inlined_call_operand.vmem [shape: f32[2,1,128], index: 12, kind: input, shape index: {}]   ;;  %s3456_s13 = inlined_call_operand.vmem [shape: bf16[2,128,128], index: 13, kind: input, shape index: {}]   ;;  %s3457_s14 = inlined_call_operand.vmem [shape: f32[2,1,128], index: 14, kind: input, shape index: {}]   ;;  %s3458_s15 = inlined_call_operand.vmem [shape: bf16[2,128,128], index: 15, kind: input, shape index: {}]   ;;  %s3459_s16 = inlined_call_operand.vmem [shape: f32[2,1,128], index: 16, kind: input, shape index: {}]   ;;  %s3460_s17 = inlined_call_operand.vmem [shape: f32[2,8,128], index: 17, kind: output, shape index: {}]  }
   0x1   :  { %3465 = sst [smem:[#allocation7_spill]] %s3443_s0  ;;  %s3050_s26 = smov 0  }
   0x2   :  { %3466 = sst [smem:[#allocation8_spill]] %s3444_s1 }
   0x3   :  { %3467 = sst [smem:[#allocation9_spill]] %s3445_s2 }
   0x4   :  { %3468 = sst [smem:[#allocation10_spill]] %s3447_s4 }
   0x5   :  { %3469 = sst [smem:[#allocation11_spill]] %s3448_s5 }
   0x6   :  { %3470 = sst [smem:[#allocation12_spill]] %s3449_s6 }
   0x7   :  { %3471 = sst [smem:[#allocation13_spill]] %s3450_s7 }
   0x8   :  { %3472 = sst [smem:[#allocation14_spill]] %s3451_s8 }
   0x9   :  { %3473 = sst [smem:[#allocation15_spill]] %s3460_s17 }
   0xa LB: > { %3474 = sst [smem:[#allocation3_spill]] %s2947_s25  ;;  %s36_s27 = sadd.s32 1, %s2947_s25  ;;  %s2951_s26 = sphi %s3050_s26, %s27_s26   ;;  %s2947_s25 = sphi %s3048_s25, %s3495_s25   ;;  %s2943_s24 = sphi %s3046_s24, %s3494_s24  }
   0xb   : > { %3475 = sst [smem:[#allocation4_spill]] %s2951_s26  ;;  %p2479_p0 = scmp.ge.s32.totalorder %s2951_s26, 1 }
   0xc   : > { %p37_p1 = scmp.ge.s32.totalorder %s36_s27, 2  ;;  %p633_p2 = scmp.lt.s32.totalorder %s2951_s26, 3 }
   0xe   : > { %s3497_s27 = smov (%p37_p1, %s36_s27), 0  ;;  %p634_p3 = pnand %p2479_p0, %p633_p2 }
   0xf   : > { %3476 = sst [smem:[#allocation5_spill]] %s3497_s27 }
  0x10   : > { %637 = sbr.rel (%p634_p3) target bundleno = 2710 (0xa96), region = 88 }
  0x15   : > { %p753_p4 = scmp.lt.s32.totalorder %s2943_s24, 1  ;;  %s3478_s5 = sld [smem:[#allocation11_spill]] }
  0x16   : > { %s3479_s6 = sld [smem:[#allocation12_spill]]  ;;  %p2492_p5 = scmp.ne.s32.totalorder %s2943_s24, 0 }
  0x17   : > { %s3068_s28 = scalar_select %p753_p4, %s2943_s24, 1 }
  0x18   : > { %s3481_s7 = sld [smem:[#allocation13_spill]] }
  0x19   : > { %s2589_s20 = sshll.u32 %s3068_s28, 7  ;;  %s2482_s21 = sshll.u32 %s3068_s28, 1 }
  0x1a   : > { %s2590_s26 = sshll.u32 %s3068_s28, 8  ;;  %s2485_s17 = sshll.u32 %s3068_s28, 2 }
  0x1b   : > { %s3083_s29 = scalar_lea.vmem %s3478_s5, %s2589_s20  ;;  %s3482_s8 = sld [smem:[#allocation14_spill]] }
  0x1c   : > { %s3088_s25 = scalar_lea.vmem %s3479_s6, %s2482_s21  ;;  %s3105_s5 = scalar_lea.vmem %s3452_s9, %s2589_s20 }
  0x1d   : > { %3480 = sst [smem:[#allocation6_spill]] %s3088_s25  ;;  %s787_s2 = scalar_lea.vmem %s3454_s11, %s3068_s28 }
  0x1e   : > { %s3095_s18 = scalar_lea.vmem %s3481_s7, %s2590_s26  ;;  %s790_s7 = scalar_lea.vmem %s3455_s12, %s3068_s28 }
  0x1f   : > { %s2592_s1 = sshll.u32 %s3068_s28, 6  ;;  %s806_s26 = scalar_lea.vmem %s3459_s16, %s3068_s28 }
  0x20   : > { %s3127_s23 = scalar_lea.vmem %s3456_s13, %s2592_s1  ;;  %s3132_s0 = scalar_lea.vmem %s3458_s15, %s2592_s1 }
  0x21   : > { %s3100_s4 = scalar_lea.vmem %s3482_s8, %s2485_s17  ;;  %817 = sbr.rel (%p2492_p5) target bundleno = 42 (0x2a), region = 92 }
  0x22   : > { %s3483_s19 = sld [smem:[#allocation7_spill]] (!%p2492_p5) }
  0x28   : > { %v818_v0 = vld [vmem:[%s3483_s19] sm:$0xff]  ;;  %v819_v1 = vld [vmem:[%s3483_s19 + $0x8] sm:$0xff] }
  0x29   : > { %820 = vst [vmem:[#allocation2] sm:$0xff] %v818_v0  ;;  %821 = vst [vmem:[#allocation2 + $0x8] sm:$0xff] %v819_v1 }
  0x2a PF: > { %v2801_v4 = vld [vmem:[%s3095_s18 + $0xe4] ss:$16 sps:$4 sm:$0xff]   ;;  %v2803_v5 = vld [vmem:[%s3095_s18 + $0xe0] ss:$16 sps:$4 sm:$0xff]   ;;  %v822_v14 = vlaneseq  ;;  %v2953_v18 = vmov 0.0   ;;  %v2954_v44 = vmov 0   ;;  %s3489_s17 = scalar_lea.vmem %s3453_s10, %s3068_s28 }
  0x2b   : > { %v2804_v6 = vld [vmem:[%s3095_s18 + $0xc4] ss:$16 sps:$4 sm:$0xff]   ;;  %1238 = vmatprep.subr.bf16.mxu1 %v2801_v4  ;;  %v2806_v7 = vld [vmem:[%s3095_s18 + $0xc0] ss:$16 sps:$4 sm:$0xff]   ;;  %1270 = vmatprep.mubr.bf16.mxu1 %v2954_v44  ;;  %v2851_v52 = vld [vmem:[%s3095_s18 + $0xec] ss:$16 sps:$4 sm:$0xff]  }
  0x2c   : > { %v2807_v8 = vld [vmem:[%s3095_s18 + $0xa4] ss:$16 sps:$4 sm:$0xff]   ;;  %1239 = vmatpush1.bf16.msra.mxu1 %v2803_v5  ;;  %v2815_v10 = vld [vmem:[%s3083_s29 + $0x70] ss:$8 sps:$4 sm:$0xff]   ;;  %v823_v15 = vand.u32 127, %v822_v14  ;;  %1012 = vmatprep.mubr.bf16.mxu0 %v2954_v44  ;;  %s3485_s27 = sld [smem:[#allocation10_spill]] }
  0x2d   : > { %v2813_v9 = vld [vmem:[%s3083_s29 + $0x74] ss:$8 sps:$4 sm:$0xff]   ;;  %1240 = vmatprep.subr.bf16.mxu1 %v2804_v6  ;;  %v2809_v11 = vld [vmem:[%s3095_s18 + $0xa0] ss:$16 sps:$4 sm:$0xff]   ;;  %v2819_v30 = vld [vmem:[%s3083_s29 + $0x64] ss:$8 sps:$4 sm:$0xff]  }
  0x2e   : > { %980 = vmatprep.subr.bf16.mxu0 %v2813_v9  ;;  %v2810_v12 = vld [vmem:[%s3095_s18 + $0x84] ss:$16 sps:$4 sm:$0xff]   ;;  %v2812_v13 = vld [vmem:[%s3095_s18 + $0x80] ss:$16 sps:$4 sm:$0xff]   ;;  %vm824_vm0 = vcmp.lt.s32.totalorder %v823_v15, 32  ;;  %s3487_s6 = sld [smem:[#allocation6_spill]] }
  0x2f   : > { %981 = vmatpush1.bf16.msra.mxu0 %v2815_v10  ;;  %v3163_v19 = vsel %vm824_vm0, 1.0, %v2953_v18  ;;  %v2816_v28 = vld [vmem:[%s3095_s18 + $0x64] ss:$16 sps:$4 sm:$0xff]   ;;  %v2818_v29 = vld [vmem:[%s3095_s18 + $0x60] ss:$16 sps:$4 sm:$0xff]   ;;  %vm2955_vm1 = vmmov 0  }
  0x30   : > { %v3145_v2 = vld [vmem:[#allocation2] sm:$0xff]  ;;  %v3147_v3 = vld [vmem:[#allocation2 + $0x8] sm:$0xff]  ;;  %1241 = vmatpush1.bf16.msra.mxu1 %v2806_v7  ;;  %982 = vmatprep.subr.bf16.mxu0 %v2819_v30  ;;  %v2825_v34 = vld [vmem:[%s3083_s29 + $0x54] ss:$8 sps:$4 sm:$0xff]   ;;  %vm1471_vm2 = vcmask 1043456   ;;  %s3488_s25 = sld [smem:[#allocation9_spill]] }
  0x31   : > { %831 = vadd.xlane.f32.xlu0 %v3145_v2  ;;  %1242 = vmatprep.subr.bf16.mxu1 %v2807_v8  ;;  %v2821_v31 = vld [vmem:[%s3083_s29 + $0x60] ss:$8 sps:$4 sm:$0xff]   ;;  %v2822_v32 = vld [vmem:[%s3095_s18 + $0x44] ss:$16 sps:$4 sm:$0xff]   ;;  %v2827_v35 = vld [vmem:[%s3083_s29 + $0x50] ss:$8 sps:$4 sm:$0xff]   ;;  %v3196_v46 = vpack.c.bf16 %v3147_v3, %v3145_v2 }
  0x32   : > { %v2824_v33 = vld [vmem:[%s3095_s18 + $0x40] ss:$16 sps:$4 sm:$0xff]   ;;  %v2828_v36 = vld [vmem:[%s3095_s18 + $0x24] ss:$16 sps:$4 sm:$0xff]   ;;  %s3486_s21 = scalar_lea.vmem %s3485_s27, %s3068_s28  ;;  %v2849_v5 = vld [vmem:[%s3095_s18 + $0xe8] ss:$16 sps:$4 sm:$0xff]   ;;  %s3491_s27 = scalar_lea.vmem %s3457_s14, %s3068_s28 }
  0x33   : > { %983 = vmatpush1.bf16.msra.mxu0 %v2821_v31  ;;  %v2830_v37 = vld [vmem:[%s3095_s18 + $0x20] ss:$16 sps:$4 sm:$0xff]   ;;  %v2831_v38 = vld [vmem:[%s3083_s29 + $0x44] ss:$8 sps:$4 sm:$0xff]   ;;  %v2837_v41 = vld [vmem:[%s3083_s29 + $0x34] ss:$8 sps:$4 sm:$0xff]  }
  0x34   : > { %1243 = vmatpush1.bf16.msra.mxu1 %v2809_v11  ;;  %984 = vmatprep.subr.bf16.mxu0 %v2825_v34  ;;  %v2833_v39 = vld [vmem:[%s3083_s29 + $0x40] ss:$8 sps:$4 sm:$0xff]   ;;  %v2834_v40 = vld [vmem:[%s3095_s18 + $0x4] ss:$16 sps:$4 sm:$0xff]   ;;  %v2839_v43 = vld [vmem:[%s3083_s29 + $0x30] ss:$8 sps:$4 sm:$0xff]  }
  0x35   : > { %833 = vadd.xlane.f32.xlu0 %v3147_v3  ;;  %1244 = vmatprep.subr.bf16.mxu1 %v2810_v12  ;;  %v2836_v42 = vld [vmem:[%s3095_s18] ss:$16 sps:$4 sm:$0xff]   ;;  %v2840_v45 = vld [vmem:[%s3083_s29 + $0x24] ss:$8 sps:$4 sm:$0xff]   ;;  %v2843_v48 = vld [vmem:[%s3083_s29 + $0x14] ss:$8 sps:$4 sm:$0xff]  }
  0x36   : > { %v2842_v47 = vld [vmem:[%s3083_s29 + $0x20] ss:$8 sps:$4 sm:$0xff]   ;;  %v2845_v49 = vld [vmem:[%s3083_s29 + $0x10] ss:$8 sps:$4 sm:$0xff]   ;;  %v2846_v50 = vld [vmem:[%s3083_s29 + $0x4] ss:$8 sps:$4 sm:$0xff]  }
  0x37   : > { %985 = vmatpush1.bf16.msra.mxu0 %v2827_v35  ;;  %v2848_v51 = vld [vmem:[%s3083_s29] ss:$8 sps:$4 sm:$0xff]   ;;  %s3484_s29 = scalar_lea.vmem %s3446_s3, %s3068_s28  ;;  %v2854_v7 = vld [vmem:[%s3095_s18 + $0xcc] ss:$16 sps:$4 sm:$0xff]   ;;  %vm1443_vm3 = vcmask 64512   ;;  %s3490_s1 = sld [smem:[#allocation8_spill]] }
  0x38   : > { %1245 = vmatpush1.bf16.msra.mxu1 %v2812_v13  ;;  %986 = vmatprep.subr.bf16.mxu0 %v2831_v38  ;;  %v2494_v61 = vld [vmem:[%s3484_s29] ss:$0 sm:$0xff]  ;;  %v2852_v8 = vld [vmem:[%s3095_s18 + $0xc8] ss:$16 sps:$4 sm:$0xff]   ;;  %v2857_v9 = vld [vmem:[%s3095_s18 + $0xac] ss:$16 sps:$4 sm:$0xff]  }
  0x39   : > { %1246 = vmatprep.subr.bf16.mxu1 %v2816_v28  ;;  %v2495_v1 = vld [vmem:[%s3486_s21] ss:$0 sm:$0xff]  ;;  %v2855_v10 = vld [vmem:[%s3095_s18 + $0xa8] ss:$16 sps:$4 sm:$0xff]   ;;  %v2860_v11 = vld [vmem:[%s3095_s18 + $0x8c] ss:$16 sps:$4 sm:$0xff]  }
  0x3a   : > { %v2858_v12 = vld [vmem:[%s3095_s18 + $0x88] ss:$16 sps:$4 sm:$0xff]   ;;  %v2863_v13 = vld [vmem:[%s3095_s18 + $0x6c] ss:$16 sps:$4 sm:$0xff]  }
  0x3b   : > { %987 = vmatpush1.bf16.msra.mxu0 %v2833_v39  ;;  %v2861_v15 = vld [vmem:[%s3095_s18 + $0x68] ss:$16 sps:$4 sm:$0xff]  }
  0x3c   : > { %1247 = vmatpush1.bf16.msra.mxu1 %v2818_v29  ;;  %988 = vmatprep.subr.bf16.mxu0 %v2837_v41 }
  0x3d   : > { %1248 = vmatprep.subr.bf16.mxu1 %v2822_v32 }
  0x3f   : > { %989 = vmatpush1.bf16.msra.mxu0 %v2839_v43 }
  0x40   : > { %1249 = vmatpush1.bf16.msra.mxu1 %v2824_v33  ;;  %990 = vmatprep.subr.bf16.mxu0 %v2840_v45 }
  0x41   : > { %1250 = vmatprep.subr.bf16.mxu1 %v2828_v36 }
  0x43   : > { %991 = vmatpush1.bf16.msra.mxu0 %v2842_v47 }
  0x44   : > { %1251 = vmatpush1.bf16.msra.mxu1 %v2830_v37  ;;  %992 = vmatprep.subr.bf16.mxu0 %v2843_v48 }
  0x45   : > { %1252 = vmatprep.subr.bf16.mxu1 %v2834_v40 }
  0x47   : > { %993 = vmatpush1.bf16.msra.mxu0 %v2845_v49 }
  0x48   : > { %1253 = vmatpush1.bf16.msra.mxu1 %v2836_v42  ;;  %994 = vmatprep.subr.bf16.mxu0 %v2846_v50 }
  0x49   : > { %2646 = vmatprep.subr.bf16.mxu1 %v2953_v18 }
  0x4b   : > { %1271 = vmatmul.mubr.bf16.vlgmr.msra.gmra.mxu1 %v3196_v46  ;;  %995 = vmatpush1.bf16.msra.mxu0 %v2848_v51 }
  0x4c   : > { %1281 = vmatprep.subr.bf16.mxu0 %v2851_v52  ;;  %2648 = vmatprep.mubr.msk.bf16.mxu1 %vm2955_vm1, %v2953_v18 }
  0xba   : > { %v832_v16 = vpop.xlane.xlu0 %831 }
  0xbb   : > { %v835_v17 = vmul.f32 0.03125, %v832_v16  ;;  %v2866_v16 = vld [vmem:[%s3095_s18 + $0x4c] ss:$16 sps:$4 sm:$0xff]  }
  0xbd   : > { %v837_v20 = vsub.f32 %v3145_v2, %v835_v17  ;;  %v2864_v17 = vld [vmem:[%s3095_s18 + $0x48] ss:$16 sps:$4 sm:$0xff]  }
  0xbe   : > { %v834_v21 = vpop.xlane.xlu0 %833 }
  0xbf   : > { %v836_v22 = vmul.f32 0.03125, %v834_v21  ;;  %v3167_v23 = vmul.f32 %v3163_v19, %v837_v20  ;;  %v2869_v20 = vld [vmem:[%s3095_s18 + $0x2c] ss:$16 sps:$4 sm:$0xff]   ;;  %v2867_v21 = vld [vmem:[%s3095_s18 + $0x28] ss:$16 sps:$4 sm:$0xff]  }
  0xc1   : > { %v838_v24 = vsub.f32 %v3147_v3, %v836_v22  ;;  %v841_v25 = vmul.f32 %v3167_v23, %v3167_v23  ;;  %v2872_v22 = vld [vmem:[%s3095_s18 + $0xc] ss:$16 sps:$4 sm:$0xff]  }
  0xc3   : > { %843 = vadd.xlane.f32.xlu1 %v841_v25  ;;  %v3173_v26 = vmul.f32 %v3163_v19, %v838_v24  ;;  %v891_v24 = vshrl.u32 %v822_v14, 7  ;;  %v888_v14 = vld [vmem:[%s3487_s6] sm:$0x3] }
  0xc5   : > { %v842_v27 = vmul.f32 %v3173_v26, %v3173_v26  ;;  %v3242_v25 = vsub.s32 0, %v891_v24  ;;  %v1068_v52 = vsub.s32 2, %v891_v24 }
  0xc7   : > { %845 = vadd.xlane.f32.xlu1 %v842_v27  ;;  %v3245_v27 = vsub.s32 1, %v891_v24  ;;  %v893_v36 = vrot.slane %v888_v14, %v3242_v25 }
  0xc9   : > { %v897_v38 = vrot.slane %v888_v14, %v3245_v27 }
 0x10b   : > { %v1272_v30 = vpop.f32.mrf.mxu1 }
 0x10d   : > { %v1274_v32 = vpop.f32.mrf.mxu1 }
 0x10f   : > { %v1276_v37 = vpop.f32.mrf.mxu1 }
 0x14c   : > { %v844_v53 = vpop.xlane.xlu1 %843 }
 0x14d   : > { %v847_v54 = vmul.f32 0.03125, %v844_v53  ;;  %v1072_v53 = vsub.s32 3, %v891_v24 }
 0x14f   : > { %v849_v55 = vadd.f32 1e-08, %v847_v54 }
 0x150   : > { %v846_v56 = vpop.xlane.xlu1 %845 }
 0x151   : > { %2905 = vrsqrt.f32 %v849_v55  ;;  %v848_v57 = vmul.f32 0.03125, %v846_v56 }
 0x153   : > { %v850_v58 = vadd.f32 1e-08, %v848_v57 }
 0x155   : > { %2907 = vrsqrt.f32 %v850_v58 }
 0x15e   : > { %v2906_v59 = vpop.eup %2905 }
 0x15f   : > { %v853_v60 = vmul.f32 %v2906_v59, %v3167_v23  ;;  %v2870_v23 = vld [vmem:[%s3095_s18 + $0x8] ss:$16 sps:$4 sm:$0xff]   ;;  %s3492_s18 = sld [smem:[#allocation15_spill]] }
 0x161   : > { %v861_v0 = vmul.f32 %v2494_v61, %v853_v60 }
 0x162   : > { %v2908_v62 = vpop.eup %2907 }
 0x163   : > { %v854_v63 = vmul.f32 %v2908_v62, %v3173_v26  ;;  %v3218_v3 = vadd.f32 %v2495_v1, %v861_v0  ;;  %v1056_v26 = vld [vmem:[%s3100_s4] sm:$0xf] }
 0x164   : > { %v1061_v28 = vrot.slane %v1056_v26, %v3242_v25  ;;  %v3249_v29 = vrot.slane %v1056_v26, %v3245_v27  ;;  %v1069_v54 = vrot.slane %v1056_v26, %v1068_v52  ;;  %v1073_v55 = vrot.slane %v1056_v26, %v1072_v53 }
 0x165   : > { %v862_v2 = vmul.f32 %v2494_v61, %v854_v63 }
 0x166   : > { %v1273_v31 = vadd.f32 %v1272_v30, %v1061_v28  ;;  %v1275_v34 = vadd.f32 %v1274_v32, %v3249_v29  ;;  %v1277_v39 = vadd.f32 %v1276_v37, %v1061_v28 }
 0x167   : > { %v3220_v4 = vadd.f32 %v2495_v1, %v862_v2 }
 0x168   : > { %v1359_v33 = vpack.c.bf16 %v1273_v31, %v1273_v31  ;;  %v1564_v35 = vpack.c.bf16 %v1275_v34, %v1275_v34  ;;  %v1360_v45 = vpack.c.bf16 %v1277_v39, %v1277_v39 }
 0x169   : > { %v871_v6 = vpack.c.bf16 %v3220_v4, %v3218_v3 }
 0x16a   : > { %2647 = vmatpush3.bf16.xpose.msra.mxu1 %v1359_v33 }
 0x16b   : > { %1013 = vmatmul.mubr.bf16.vlgmr.msra.gmra.mxu0 %v871_v6  ;;  %2652 = vmatprep.subr.bf16.mxu1 %v2953_v18 }
 0x16c   : > { %1282 = vmatpush1.bf16.msra.mxu0 %v2849_v5  ;;  %1313 = vmatprep.mubr.bf16.mxu0 %v2954_v44 }
 0x16d   : > { %1283 = vmatprep.subr.bf16.mxu0 %v2854_v7 }
 0x170   : > { %1284 = vmatpush1.bf16.msra.mxu0 %v2852_v8 }
 0x171   : > { %1285 = vmatprep.subr.bf16.mxu0 %v2857_v9 }
 0x174   : > { %1286 = vmatpush1.bf16.msra.mxu0 %v2855_v10  ;;  %v1278_v10 = vpop.f32.mrf.mxu1 }
 0x175   : > { %1287 = vmatprep.subr.bf16.mxu0 %v2860_v11  ;;  %v3281_v11 = vld [vmem:[%s3488_s25] sm:$0xff] }
 0x178   : > { %1288 = vmatpush1.bf16.msra.mxu0 %v2858_v12 }
 0x179   : > { %1289 = vmatprep.subr.bf16.mxu0 %v2863_v13 }
 0x17c   : > { %1290 = vmatpush1.bf16.msra.mxu0 %v2861_v15 }
 0x17d   : > { %1291 = vmatprep.subr.bf16.mxu0 %v2866_v16 }
 0x180   : > { %1292 = vmatpush1.bf16.msra.mxu0 %v2864_v17 }
 0x181   : > { %1293 = vmatprep.subr.bf16.mxu0 %v2869_v20 }
 0x184   : > { %1294 = vmatpush1.bf16.msra.mxu0 %v2867_v21 }
 0x185   : > { %1295 = vmatprep.subr.bf16.mxu0 %v2872_v22 }
 0x188   : > { %1296 = vmatpush1.bf16.msra.mxu0 %v2870_v23 }
 0x189   : > { %2670 = vmatprep.subr.bf16.mxu0 %v2953_v18 }
 0x18b   : > { %1314 = vmatmul.mubr.bf16.vlgmr.msra.gmra.mxu0 %v3196_v46 }
 0x18c   : > { %2671 = vmatpush3.bf16.xpose.msra.mxu0 %v1564_v35  ;;  %2672 = vmatprep.mubr.msk.bf16.mxu0 %vm2955_vm1, %v2953_v18 }
 0x18d   : > { %2682 = vmatprep.subr.bf16.mxu0 %v2953_v18 }
 0x22b   : > { %v1014_v40 = vpop.f32.mrf.mxu0 }
 0x22c   : > { %v1015_v41 = vadd.f32 %v1014_v40, %v893_v36 }
 0x22d   : > { %v1016_v42 = vpop.f32.mrf.mxu0 }
 0x22e   : > { %v1357_v43 = vpack.c.bf16 %v1015_v41, %v1015_v41  ;;  %v1017_v44 = vadd.f32 %v1016_v42, %v897_v38 }
 0x22f   : > { %v1018_v46 = vpop.f32.mrf.mxu0 }
 0x230   : > { %v1562_v47 = vpack.c.bf16 %v1017_v44, %v1017_v44  ;;  %2649 = vmatmul.mubr.bf16.vlgmr.msra.gmra.mxu1 %v1357_v43  ;;  %v1019_v49 = vadd.f32 %v1018_v46, %v893_v36 }
 0x231   : > { %2653 = vmatpush3.bf16.xpose.msra.mxu1 %v1360_v45  ;;  %v1020_v48 = vpop.f32.mrf.mxu0  ;;  %2654 = vmatprep.mubr.msk.bf16.mxu1 %vm2955_vm1, %v2953_v18 }
 0x232   : > { %v3263_v50 = vadd.f32 %v1020_v48, %v897_v38  ;;  %2673 = vmatmul.mubr.bf16.vlgmr.msra.gmra.mxu0 %v1562_v47  ;;  %2658 = vmatprep.subr.bf16.mxu1 %v2953_v18  ;;  %v1358_v51 = vpack.c.bf16 %v1019_v49, %v1019_v49 }
 0x233   : > { %2684 = vmatprep.mubr.msk.bf16.mxu0 %vm2955_vm1, %v2953_v18 }
 0x238   : > { %2655 = vmatmul.mubr.bf16.vlgmr.msra.gmra.mxu1 %v1358_v51 }
 0x239   : > { %2660 = vmatprep.mubr.msk.bf16.mxu1 %vm2955_vm1, %v2953_v18 }
 0x24b   : > { %v1315_v56 = vpop.f32.mrf.mxu0 }
 0x24c   : > { %v1316_v57 = vadd.f32 %v1315_v56, %v1069_v54  ;;  %v1279_v56 = vadd.f32 %v1278_v10, %v3249_v29 }
 0x24d   : > { %v1317_v58 = vpop.f32.mrf.mxu0 }
 0x24e   : > { %v1361_v59 = vpack.c.bf16 %v1316_v57, %v1316_v57  ;;  %v1318_v60 = vadd.f32 %v1317_v58, %v1073_v55 }
 0x24f   : > { %v1319_v61 = vpop.f32.mrf.mxu0 }
 0x250   : > { %v1473_v62 = vsel %vm1471_vm2, %v1361_v59, 0  ;;  %v1566_v63 = vpack.c.bf16 %v1318_v60, %v1318_v60  ;;  %v1320_v0 = vadd.f32 %v1319_v61, %v1069_v54  ;;  %v1565_v60 = vpack.c.bf16 %v1279_v56, %v1279_v56 }
 0x251   : > { %v1321_v1 = vpop.f32.mrf.mxu0  ;;  %2659 = vmatpush3.bf16.msra.mxu1 %v1473_v62  ;;  %v1563_v61 = vpack.c.bf16 %v3263_v50, %v3263_v50 }
 0x252   : > { %v1676_v2 = vsel %vm1471_vm2, %v1566_v63, 0  ;;  %v1362_v5 = vpack.c.bf16 %v1320_v0, %v1320_v0  ;;  %v1322_v6 = vadd.f32 %v1321_v1, %v1073_v55  ;;  %2664 = vmatprep.subr.bf16.mxu1 %v2953_v18 }
 0x253   : > { %2683 = vmatpush3.bf16.msra.mxu0 %v1676_v2 }
 0x254   : > { %v1519_v7 = vsel %vm1471_vm2, %v1362_v5, 0  ;;  %v1567_v8 = vpack.c.bf16 %v1322_v6, %v1322_v6  ;;  %2694 = vmatprep.subr.bf16.mxu0 %v2953_v18 }
 0x256   : > { %v3276_v9 = vsel %vm1471_vm2, %v1567_v8, 0 }
 0x2f0   : > { %v1397_v12 = vpop.f32.mrf.mxu1 }
 0x2f1   : > { %v1398_v13 = vadd.f32 %v1397_v12, %v3281_v11 }
 0x2f2   : > { %v2650_v15 = vpop.f32.mrf.mxu1  ;;  %v1602_v16 = vpop.f32.mrf.mxu0 }
 0x2f3   : > { %v1444_v17 = vsel %vm1443_vm3, %v1398_v13, -inf  ;;  %v1603_v40 = vadd.f32 %v1602_v16, %v3281_v11 }
 0x2f4   : > { %v2674_v20 = vpop.f32.mrf.mxu0  ;;  %1445 = vmax.xlane.f32.xlu0 %v1444_v17  ;;  %v1400_v21 = vpop.f32.mrf.mxu1 }
 0x2f5   : > { %v1648_v42 = vsel %vm1443_vm3, %v1603_v40, -inf }
 0x2f6   : > { %v2651_v22 = vpop.f32.mrf.mxu1  ;;  %v1605_v23 = vpop.f32.mrf.mxu0 }
 0x2f8   : > { %v1437_v24 = vpop.f32.mrf.mxu1  ;;  %v2675_v26 = vpop.f32.mrf.mxu0 }
 0x2f9   : > { %v1438_v28 = vadd.f32 %v1437_v24, %v3281_v11 }
 0x2fa   : > { %v2656_v30 = vpop.f32.mrf.mxu1 }
 0x2fb   : > { %v1447_v31 = vsel %vm1443_vm3, %v1438_v28, -inf }
 0x2fc   : > { %1448 = vmax.xlane.f32.xlu1 %v1447_v31  ;;  %v1440_v32 = vpop.f32.mrf.mxu1 }
 0x2fd   : > { %v2881_v32 = vld [vmem:[%s3105_s5 + $0x78] sm:$0xff]  }
 0x2fe   : > { %v2657_v33 = vpop.f32.mrf.mxu1 }
 0x2ff   : > { %v2882_v33 = vld [vmem:[%s3105_s5 + $0x70] sm:$0xff]  }
 0x37d   : > { %v1446_v34 = vpop.xlane.xlu0 %1445 }
 0x37e   : > { %v1450_v35 = vsub.f32 %v1398_v13, %v1446_v34  ;;  %v2883_v34 = vld [vmem:[%s3105_s5 + $0x68] sm:$0xff]  }
 0x380   : > { %v1452_v14 = vmul.f32 1.442695, %v1450_v35  ;;  %v2884_v35 = vld [vmem:[%s3105_s5 + $0x60] sm:$0xff]  }
 0x382   : > { %2909 = vpow2.f32 %v1452_v14  ;;  %v2885_v14 = vld [vmem:[%s3105_s5 + $0x58] sm:$0xff]  }
 0x385   : > { %v1449_v36 = vpop.xlane.xlu1 %1448 }
 0x386   : > { %v1451_v37 = vsub.f32 %v1438_v28, %v1449_v36  ;;  %v2886_v36 = vld [vmem:[%s3105_s5 + $0x50] sm:$0xff]  }
 0x388   : > { %v1454_v38 = vmul.f32 1.442695, %v1451_v37  ;;  %v2887_v37 = vld [vmem:[%s3105_s5 + $0x48] sm:$0xff]  }
 0x38a   : > { %2911 = vpow2.f32 %v1454_v38 }
 0x38f   : > { %v2910_v39 = vpop.eup %2909 }
 0x390   : > { %v1456_v41 = vsel %vm1443_vm3, %v2910_v39, 0.0 }
 0x391   : > { %1457 = vadd.xlane.f32.xlu0 %v1456_v41  ;;  %v2873_v41 = vld [vmem:[%s3105_s5 + $0x38] sm:$0xff]  }
 0x395   : > { %1649 = vmax.xlane.f32.xlu0 %v1648_v42 }
 0x397   : > { %v2912_v43 = vpop.eup %2911 }
 0x398   : > { %v1459_v44 = vsel %vm1443_vm3, %v2912_v43, 0.0 }
 0x399   : > { %1460 = vadd.xlane.f32.xlu1 %v1459_v44  ;;  %v2875_v44 = vld [vmem:[%s3105_s5 + $0x28] sm:$0xff]  }
 0x41a   : > { %v1458_v45 = vpop.xlane.xlu0 %1457 }
 0x41b   : > { %2913 = vrcp.f32 %v1458_v45  ;;  %v2876_v45 = vld [vmem:[%s3105_s5 + $0x20] sm:$0xff]  }
 0x41e   : > { %v1650_v46 = vpop.xlane.xlu0 %1649 }
 0x41f   : > { %v1654_v47 = vsub.f32 %v1603_v40, %v1650_v46  ;;  %v2877_v46 = vld [vmem:[%s3105_s5 + $0x18] sm:$0xff]  }
 0x421   : > { %v1656_v48 = vmul.f32 1.442695, %v1654_v47  ;;  %v2878_v47 = vld [vmem:[%s3105_s5 + $0x10] sm:$0xff]  }
 0x422   : > { %v1461_v49 = vpop.xlane.xlu1 %1460 }
 0x423   : > { %2915 = vpow2.f32 %v1656_v48  ;;  %v2879_v48 = vld [vmem:[%s3105_s5 + $0x8] sm:$0xff]  }
 0x424   : > { %2917 = vrcp.f32 %v1461_v49  ;;  %v2880_v49 = vld [vmem:[%s3105_s5] sm:$0xff]  }
 0x428   : > { %v2914_v51 = vpop.eup %2913 }
 0x429   : > { %v1464_v52 = vmul.f32 %v2914_v51, %v2910_v39  ;;  %v2888_v51 = vld [vmem:[%s3105_s5 + $0x40] sm:$0xff]  }
 0x42b   : > { %v1466_v53 = vpack.c.bf16 %v1464_v52, %v1464_v52 }
 0x42d   : > { %2661 = vmatmul.mubr.msk.bf16.vlgmr.msra.gmra.mxu1 %vm1443_vm3, %v1466_v53 }
 0x42e   : > { %2665 = vmatpush3.bf16.msra.mxu1 %v1519_v7  ;;  %2666 = vmatprep.mubr.msk.bf16.mxu1 %vm2955_vm1, %v2953_v18 }
 0x42f   : > { %2676 = vmatprep.subr.bf16.mxu1 %v2953_v18 }
 0x430   : > { %v2916_v54 = vpop.eup %2915 }
 0x431   : > { %v2918_v55 = vpop.eup %2917  ;;  %v1660_v57 = vsel %vm1443_vm3, %v2916_v54, 0.0 }
 0x432   : > { %1661 = vadd.xlane.f32.xlu0 %v1660_v57  ;;  %v1465_v58 = vmul.f32 %v2918_v55, %v2912_v43  ;;  %v2874_v43 = vld [vmem:[%s3105_s5 + $0x30] sm:$0xff]  }
 0x434   : > { %v1467_v59 = vpack.c.bf16 %v1465_v58, %v1465_v58 }
 0x436   : > { %2667 = vmatmul.mubr.msk.bf16.vlgmr.msra.gmra.mxu1 %vm1443_vm3, %v1467_v59 }
 0x437   : > { %2677 = vmatpush3.bf16.xpose.msra.mxu1 %v1565_v60  ;;  %2678 = vmatprep.mubr.msk.bf16.mxu1 %vm2955_vm1, %v2953_v18 }
 0x438   : > { %2688 = vmatprep.subr.bf16.mxu1 %v2953_v18 }
 0x43e   : > { %2679 = vmatmul.mubr.bf16.vlgmr.msra.gmra.mxu1 %v1563_v61 }
 0x43f   : > { %2689 = vmatpush3.bf16.msra.mxu1 %v3276_v9  ;;  %2690 = vmatprep.mubr.msk.bf16.mxu1 %vm2955_vm1, %v2953_v18 }
 0x440   : > { %2714 = vmatprep.subr.bf16.mxu1 %v2953_v18 }
 0x4bb   : > { %v1662_v29 = vpop.xlane.xlu0 %1661 }
 0x4bc   : > { %2919 = vrcp.f32 %v1662_v29  ;;  %v2564_v29 = vld [vmem:[%s3489_s17] ss:$0 sm:$0xff] }
 0x4c9   : > { %v2920_v62 = vpop.eup %2919 }
 0x4ca   : > { %v1668_v63 = vmul.f32 %v2920_v62, %v2916_v54 }
 0x4cc   : > { %v1670_v0 = vpack.c.bf16 %v1668_v63, %v1668_v63 }
 0x4ce   : > { %2685 = vmatmul.mubr.msk.bf16.vlgmr.msra.gmra.mxu0 %vm1443_vm3, %v1670_v0 }
 0x4cf   : > { %2710 = vmatprep.mubr.msk.bf16.mxu0 %vm2955_vm1, %v2953_v18  ;;  %2695 = vmatpush3.bf16.msra.mxu0 %v2881_v32  ;;  %v2900_v32 = vld [vmem:[%s3132_s0 + $0x20] sm:$0xff]  }
 0x4d0   : > { %2696 = vmatprep.subr.bf16.mxu0 %v2953_v18 }
 0x4d3   : > { %2697 = vmatpush3.bf16.msra.mxu0 %v2882_v33  ;;  %v2901_v33 = vld [vmem:[%s3132_s0 + $0x18] sm:$0xff]  }
 0x4d4   : > { %2698 = vmatprep.subr.bf16.mxu0 %v2953_v18 }
 0x4d7   : > { %2699 = vmatpush3.bf16.msra.mxu0 %v2883_v34 }
 0x4d8   : > { %2700 = vmatprep.subr.bf16.mxu0 %v2953_v18 }
 0x4db   : > { %2701 = vmatpush3.bf16.msra.mxu0 %v2884_v35 }
 0x4dc   : > { %2702 = vmatprep.subr.bf16.mxu0 %v2953_v18 }
 0x4df   : > { %2703 = vmatpush3.bf16.msra.mxu0 %v2885_v14 }
 0x4e0   : > { %2704 = vmatprep.subr.bf16.mxu0 %v2953_v18 }
 0x4e3   : > { %2705 = vmatpush3.bf16.msra.mxu0 %v2886_v36 }
 0x4e4   : > { %2706 = vmatprep.subr.bf16.mxu0 %v2953_v18 }
 0x4e7   : > { %2707 = vmatpush3.bf16.msra.mxu0 %v2887_v37 }
 0x4e8   : > { %2708 = vmatprep.subr.bf16.mxu0 %v2953_v18 }
 0x4eb   : > { %2709 = vmatpush3.bf16.msra.mxu0 %v2888_v51  ;;  %v2902_v51 = vld [vmem:[%s3132_s0 + $0x10] sm:$0xff]  }
 0x4ec   : > { %2734 = vmatprep.subr.bf16.mxu0 %v2953_v18 }
 0x4ed   : > { %v3310_v1 = vpop.f32.mrf.mxu1 }
 0x4ef   : > { %v2662_v50 = vpop.f32.mrf.mxu1 }
 0x4f1   : > { %v1512_v2 = vpop.f32.mrf.mxu1 }
 0x4f3   : > { %v2663_v5 = vpop.f32.mrf.mxu1 }
 0x4f6   : > { %v3312_v6 = vpop.f32.mrf.mxu1 }
 0x4f7   : > { %v1561_v7 = vpack.c.bf16 %v3312_v6, %v3310_v1 }
 0x4f8   : > { %v2668_v8 = vpop.f32.mrf.mxu1 }
 0x4f9   : > { %v2889_v8 = vld [vmem:[%s3127_s23 + $0x38] sm:$0xff]  }
 0x4fa   : > { %v1558_v9 = vpop.f32.mrf.mxu1 }
 0x4fc   : > { %v2669_v10 = vpop.f32.mrf.mxu1 }
 0x4fe   : > { %v1642_v12 = vpop.f32.mrf.mxu1 }
 0x4ff   : > { %v1643_v13 = vadd.f32 %v1642_v12, %v3281_v11 }
 0x500   : > { %v2680_v15 = vpop.f32.mrf.mxu1 }
 0x501   : > { %v1651_v16 = vsel %vm1443_vm3, %v1643_v13, -inf }
 0x502   : > { %1652 = vmax.xlane.f32.xlu1 %v1651_v16  ;;  %v1645_v17 = vpop.f32.mrf.mxu1 }
 0x504   : > { %v2681_v20 = vpop.f32.mrf.mxu1 }
 0x58b   : > { %v1653_v21 = vpop.xlane.xlu1 %1652 }
 0x58c   : > { %v1655_v22 = vsub.f32 %v1643_v13, %v1653_v21  ;;  %v2890_v21 = vld [vmem:[%s3127_s23 + $0x30] sm:$0xff]  }
 0x58e   : > { %v1658_v23 = vmul.f32 1.442695, %v1655_v22  ;;  %v3318_v24 = vpop.f32.mrf.mxu0  ;;  %v2891_v22 = vld [vmem:[%s3127_s23 + $0x28] sm:$0xff]  }
 0x590   : > { %2921 = vpow2.f32 %v1658_v23  ;;  %v2686_v26 = vpop.f32.mrf.mxu0  ;;  %v2892_v23 = vld [vmem:[%s3127_s23 + $0x20] sm:$0xff]  }
 0x591   : > { %v2895_v26 = vld [vmem:[%s3127_s23 + $0x8] sm:$0xff]  }
 0x592   : > { %v1715_v28 = vpop.f32.mrf.mxu0 }
 0x593   : > { %v2896_v28 = vld [vmem:[%s3127_s23] sm:$0xff]  }
 0x594   : > { %v2687_v11 = vpop.f32.mrf.mxu0 }
 0x595   : > { %v2897_v11 = vld [vmem:[%s3132_s0 + $0x38] sm:$0xff]  }
 0x59d   : > { %v2922_v30 = vpop.eup %2921 }
 0x59e   : > { %v1663_v31 = vsel %vm1443_vm3, %v2922_v30, 0.0 }
 0x59f   : > { %1664 = vadd.xlane.f32.xlu1 %v1663_v31  ;;  %v2899_v31 = vld [vmem:[%s3132_s0 + $0x28] sm:$0xff]  }
 0x628   : > { %v1665_v38 = vpop.xlane.xlu1 %1664 }
 0x629   : > { %2923 = vrcp.f32 %v1665_v38 }
 0x636   : > { %v2924_v39 = vpop.eup %2923 }
 0x637   : > { %v1669_v40 = vmul.f32 %v2924_v39, %v2922_v30  ;;  %v2898_v30 = vld [vmem:[%s3132_s0 + $0x30] sm:$0xff]  }
 0x639   : > { %v1671_v42 = vpack.c.bf16 %v1669_v40, %v1669_v40 }
 0x63b   : > { %2691 = vmatmul.mubr.msk.bf16.vlgmr.msra.gmra.mxu1 %vm1443_vm3, %v1671_v42 }
 0x63c   : > { %2715 = vmatpush3.bf16.msra.mxu1 %v2873_v41  ;;  %2730 = vmatprep.mubr.msk.bf16.mxu1 %vm2955_vm1, %v2953_v18  ;;  %v2565_v41 = vld [vmem:[%s787_s2] ss:$0 sm:$0xff] }
 0x63d   : > { %2716 = vmatprep.subr.bf16.mxu1 %v2953_v18 }
 0x640   : > { %2717 = vmatpush3.bf16.msra.mxu1 %v2874_v43 }
 0x641   : > { %2718 = vmatprep.subr.bf16.mxu1 %v2953_v18 }
 0x644   : > { %2719 = vmatpush3.bf16.msra.mxu1 %v2875_v44 }
 0x645   : > { %2720 = vmatprep.subr.bf16.mxu1 %v2953_v18 }
 0x648   : > { %2721 = vmatpush3.bf16.msra.mxu1 %v2876_v45  ;;  %v2566_v45 = vld [vmem:[%s790_s7] ss:$0 sm:$0xff] }
 0x649   : > { %2722 = vmatprep.subr.bf16.mxu1 %v2953_v18 }
 0x64c   : > { %2723 = vmatpush3.bf16.msra.mxu1 %v2877_v46 }
 0x64d   : > { %2724 = vmatprep.subr.bf16.mxu1 %v2953_v18 }
 0x650   : > { %2725 = vmatpush3.bf16.msra.mxu1 %v2878_v47 }
 0x651   : > { %2726 = vmatprep.subr.bf16.mxu1 %v2953_v18 }
 0x654   : > { %2727 = vmatpush3.bf16.msra.mxu1 %v2879_v48 }
 0x655   : > { %2728 = vmatprep.subr.bf16.mxu1 %v2953_v18 }
 0x658   : > { %2729 = vmatpush3.bf16.msra.mxu1 %v2880_v49 }
 0x659   : > { %2754 = vmatprep.subr.bf16.mxu1 %v2953_v18 }
 0x65b   : > { %2731 = vmatmul.mubr.bf16.vlgmr.msra.gmra.mxu1 %v1561_v7 }
 0x65c   : > { %2770 = vmatprep.mubr.msk.bf16.mxu1 %vm2955_vm1, %v2953_v18  ;;  %2755 = vmatpush3.bf16.msra.mxu1 %v2897_v11 }
 0x65d   : > { %2756 = vmatprep.subr.bf16.mxu1 %v2953_v18 }
 0x660   : > { %2757 = vmatpush3.bf16.msra.mxu1 %v2898_v30 }
 0x661   : > { %2758 = vmatprep.subr.bf16.mxu1 %v2953_v18 }
 0x664   : > { %2759 = vmatpush3.bf16.msra.mxu1 %v2899_v31 }
 0x665   : > { %2760 = vmatprep.subr.bf16.mxu1 %v2953_v18 }
 0x668   : > { %2761 = vmatpush3.bf16.msra.mxu1 %v2900_v32 }
 0x669   : > { %2762 = vmatprep.subr.bf16.mxu1 %v2953_v18 }
 0x66c   : > { %2763 = vmatpush3.bf16.msra.mxu1 %v2901_v33 }
 0x66d   : > { %2764 = vmatprep.subr.bf16.mxu1 %v2953_v18 }
 0x670   : > { %2765 = vmatpush3.bf16.msra.mxu1 %v2902_v51 }
 0x671   : > { %2766 = vmatprep.subr.bf16.mxu1 %v2953_v18 }
 0x6fb   : > { %v1758_v52 = vpop.f32.mrf.mxu1 }
 0x6fc   : > { %v1764_v53 = vpack.c.bf16 %v1758_v52, %v3318_v24  ;;  %v2893_v24 = vld [vmem:[%s3127_s23 + $0x18] sm:$0xff]   ;;  %v2903_v52 = vld [vmem:[%s3132_s0 + $0x8] sm:$0xff]  }
 0x6fd   : > { %v2692_v54 = vpop.f32.mrf.mxu1  ;;  %2767 = vmatpush3.bf16.msra.mxu1 %v2903_v52 }
 0x6fe   : > { %2711 = vmatmul.mubr.bf16.vlgmr.msra.gmra.mxu0 %v1764_v53  ;;  %2768 = vmatprep.subr.bf16.mxu1 %v2953_v18  ;;  %v2904_v53 = vld [vmem:[%s3132_s0] sm:$0xff]  }
 0x6ff   : > { %v1761_v55 = vpop.f32.mrf.mxu1  ;;  %2750 = vmatprep.mubr.msk.bf16.mxu0 %vm2955_vm1, %v2953_v18  ;;  %2735 = vmatpush3.bf16.msra.mxu0 %v2889_v8  ;;  %v2226_v54 = vld [vmem:[%s3490_s1] sm:$0x3] }
 0x700   : > { %2736 = vmatprep.subr.bf16.mxu0 %v2953_v18  ;;  %v2230_v55 = vrot.slane %v2226_v54, %v3242_v25  ;;  %v2576_v25 = vld [vmem:[%s806_s26] ss:$0 sm:$0xff] }
 0x701   : > { %v2693_v56 = vpop.f32.mrf.mxu1  ;;  %2769 = vmatpush3.bf16.msra.mxu1 %v2904_v53 }
 0x702   : > { %v2237_v56 = vrot.slane %v2226_v54, %v3245_v27 }
 0x703   : > { %2737 = vmatpush3.bf16.msra.mxu0 %v2890_v21 }
 0x704   : > { %2738 = vmatprep.subr.bf16.mxu0 %v2953_v18 }
 0x707   : > { %2739 = vmatpush3.bf16.msra.mxu0 %v2891_v22 }
 0x708   : > { %2740 = vmatprep.subr.bf16.mxu0 %v2953_v18 }
 0x70b   : > { %2741 = vmatpush3.bf16.msra.mxu0 %v2892_v23 }
 0x70c   : > { %2742 = vmatprep.subr.bf16.mxu0 %v2953_v18 }
 0x70f   : > { %2743 = vmatpush3.bf16.msra.mxu0 %v2893_v24 }
 0x710   : > { %2744 = vmatprep.subr.bf16.mxu0 %v2953_v18 }
 0x71b   : > { %v1936_v57 = vpop.f32.mrf.mxu1 }
 0x71d   : > { %v2732_v58 = vpop.f32.mrf.mxu1 }
 0x71f   : > { %v1939_v59 = vpop.f32.mrf.mxu1 }
 0x721   : > { %v2733_v60 = vpop.f32.mrf.mxu1 }
 0x7be   : > { %v1847_v61 = vpop.f32.mrf.mxu0 }
 0x7bf   : > { %v1937_v62 = vadd.f32 %v1936_v57, %v1847_v61  ;;  %v2567_v57 = vld [vmem:[%s3491_s27] ss:$0 sm:$0xff] }
 0x7c0   : > { %v2712_v63 = vpop.f32.mrf.mxu0 }
 0x7c1   : > { %v1950_v0 = vadd.f32 %v2564_v29, %v1937_v62 }
 0x7c2   : > { %v1850_v1 = vpop.f32.mrf.mxu0 }
 0x7c3   : > { %v1940_v50 = vadd.f32 %v1939_v59, %v1850_v1  ;;  %v1952_v2 = vadd.f32 %v1950_v0, %v3218_v3 }
 0x7c4   : > { %v2713_v5 = vpop.f32.mrf.mxu0 }
 0x7c5   : > { %v1951_v6 = vadd.f32 %v2564_v29, %v1940_v50  ;;  %1956 = vadd.xlane.f32.xlu0 %v1952_v2 }
 0x7c7   : > { %v1953_v7 = vadd.f32 %v1951_v6, %v3220_v4 }
 0x7c9   : > { %1958 = vadd.xlane.f32.xlu1 %v1953_v7 }
 0x84e   : > { %v1957_v9 = vpop.xlane.xlu0 %1956 }
 0x84f   : > { %v1960_v10 = vmul.f32 0.03125, %v1957_v9 }
 0x851   : > { %v1962_v12 = vsub.f32 %v1952_v2, %v1960_v10 }
 0x852   : > { %v1959_v13 = vpop.xlane.xlu1 %1958 }
 0x853   : > { %v1961_v15 = vmul.f32 0.03125, %v1959_v13  ;;  %v1964_v3 = vmul.f32 %v3163_v19, %v1962_v12 }
 0x855   : > { %v1963_v16 = vsub.f32 %v1953_v7, %v1961_v15  ;;  %v1966_v17 = vmul.f32 %v1964_v3, %v1964_v3 }
 0x857   : > { %1968 = vadd.xlane.f32.xlu0 %v1966_v17  ;;  %v1965_v4 = vmul.f32 %v3163_v19, %v1963_v16  ;;  %v2894_v19 = vld [vmem:[%s3127_s23 + $0x10] sm:$0xff]  }
 0x858   : > { %2745 = vmatpush3.bf16.msra.mxu0 %v2894_v19 }
 0x859   : > { %v1967_v20 = vmul.f32 %v1965_v4, %v1965_v4  ;;  %2746 = vmatprep.subr.bf16.mxu0 %v2953_v18 }
 0x85b   : > { %1970 = vadd.xlane.f32.xlu1 %v1967_v20 }
 0x85c   : > { %2747 = vmatpush3.bf16.msra.mxu0 %v2895_v26 }
 0x85d   : > { %2748 = vmatprep.subr.bf16.mxu0 %v2953_v18 }
 0x860   : > { %2749 = vmatpush3.bf16.msra.mxu0 %v2896_v28 }
 0x86c   : > { %2239 = vbcast.lane.b32.xlu1 %v2237_v56, 256 }
 0x86d   : > { %2232 = vbcast.lane.b32.xlu0 %v2230_v55, 256 }
 0x8e0   : > { %v1969_v34 = vpop.xlane.xlu0 %1968 }
 0x8e1   : > { %v1972_v35 = vmul.f32 0.03125, %v1969_v34 }
 0x8e3   : > { %v1974_v14 = vadd.f32 1e-08, %v1972_v35 }
 0x8e4   : > { %v1971_v36 = vpop.xlane.xlu1 %1970  ;;  %v2233_v2 = vpop.permute.xlu0 %2232 }
 0x8e5   : > { %2925 = vrsqrt.f32 %v1974_v14  ;;  %v1973_v37 = vmul.f32 0.03125, %v1971_v36 }
 0x8e7   : > { %v1975_v38 = vadd.f32 1e-08, %v1973_v37 }
 0x8e8   : > { %v2240_v10 = vpop.permute.xlu1 %2239 }
 0x8e9   : > { %2927 = vrsqrt.f32 %v1975_v38 }
 0x8f2   : > { %v2926_v39 = vpop.eup %2925 }
 0x8f3   : > { %v1978_v40 = vmul.f32 %v2926_v39, %v1964_v3 }
 0x8f5   : > { %v1986_v44 = vmul.f32 %v2565_v41, %v1978_v40 }
 0x8f6   : > { %v2928_v42 = vpop.eup %2927 }
 0x8f7   : > { %v1979_v43 = vmul.f32 %v2928_v42, %v1965_v4  ;;  %v1994_v47 = vadd.f32 %v2566_v45, %v1986_v44 }
 0x8f9   : > { %v1987_v46 = vmul.f32 %v2565_v41, %v1979_v43 }
 0x8fb   : > { %v1995_v48 = vadd.f32 %v2566_v45, %v1987_v46 }
 0x8fd   : > { %v1996_v49 = vpack.c.bf16 %v1995_v48, %v1994_v47 }
 0x8ff   : > { %2751 = vmatmul.mubr.bf16.vlgmr.msra.gmra.mxu0 %v1996_v49 }
 0x9bf   : > { %v2102_v58 = vpop.f32.mrf.mxu0 }
 0x9c0   : > { %v2103_v59 = vadd.f32 %v2567_v57, %v2102_v58 }
 0x9c1   : > { %v2752_v18 = vpop.f32.mrf.mxu0 }
 0x9c2   : > { %v2109_v62 = vmax.f32 %v2103_v59, 0.0 }
 0x9c3   : > { %v2105_v60 = vpop.f32.mrf.mxu0 }
 0x9c4   : > { %v2106_v61 = vadd.f32 %v2567_v57, %v2105_v60 }
 0x9c5   : > { %v2753_v29 = vpop.f32.mrf.mxu0 }
 0x9c6   : > { %v2110_v63 = vmax.f32 %v2106_v61, 0.0 }
 0x9c8   : > { %v2111_v0 = vpack.c.bf16 %v2110_v63, %v2109_v62 }
 0x9ca   : > { %2771 = vmatmul.mubr.bf16.vlgmr.msra.gmra.mxu1 %v2111_v0 }
 0xa8a   : > { %v2217_v27 = vpop.f32.mrf.mxu1 }
 0xa8b   : > { %v2218_v1 = vadd.f32 %v2576_v25, %v2217_v27 }
 0xa8c   : > { %v2772_v50 = vpop.f32.mrf.mxu1 }
 0xa8d   : > { %v2224_v5 = vadd.f32 %v2218_v1, %v1994_v47 }
 0xa8e   : > { %v2220_v6 = vpop.f32.mrf.mxu1 }
 0xa8f   : > { %v2241_v7 = vmul.f32 %v2233_v2, %v2224_v5  ;;  %v2221_v8 = vadd.f32 %v2576_v25, %v2220_v6 }
 0xa90   : > { %v2773_v9 = vpop.f32.mrf.mxu1 }
 0xa91   : > { %2243 = vst [vmem:[#allocation2] sm:$0xff] %v2241_v7  ;;  %2245 = vst [vmem:[%s3492_s18] sm:$0xff] %v2241_v7  ;;  %v2225_v12 = vadd.f32 %v2221_v8, %v1995_v48 }
 0xa93   : > { %v2242_v13 = vmul.f32 %v2240_v10, %v2225_v12 }
 0xa95   : > { %2244 = vst [vmem:[#allocation2 + $0x8] sm:$0xff] %v2242_v13  ;;  %2246 = vst [vmem:[%s3492_s18 + $0x8] sm:$0xff] %v2242_v13 }
 0xa96 PF: > { %s3493_s25 = sld [smem:[#allocation4_spill]] }
 0xa97   : > { %s3494_s24 = sld [smem:[#allocation3_spill]] }
 0xa9c   : > { %s27_s26 = sadd.s32 1, %s3493_s25   ;;  %s3495_s25 = sld [smem:[#allocation5_spill]] }
 0xa9d   : > { %p24_p6 = scmp.ge.s32.totalorder %s27_s26, 4  }
 0xa9f   :  { %26 = sbr.rel (!%p24_p6) target bundleno = 10 (0xa), region = 167 }

</bundles_post_ra>
